<compile_context>
chip_gen: v7x
topology: tpu7x:2x2x1
jax: 0.10.0
libtpu: 0.0.40
codegen_flags: <defaults>
</compile_context>

<pallas_src>
import math
from functools import partial

import jax
import jax.numpy as jnp
from jax.experimental import pallas as pl
from jax.experimental.pallas import tpu as pltpu
from jax.scipy.linalg import block_diag


# --------------------------------------------------------------------------
# per-generation tuning helpers
# --------------------------------------------------------------------------
_VMEM_CAP_CACHE = None


def _tpu_vmem_capacity():
    global _VMEM_CAP_CACHE
    if _VMEM_CAP_CACHE is None:
        cap = 64 * 1024 * 1024                       # conservative default (v7x)
        try:
            cap = int(pltpu.get_tpu_info().vmem_capacity_bytes)
        except Exception:
            pass
        _VMEM_CAP_CACHE = cap
    return _VMEM_CAP_CACHE


def _vmem_limit_bytes():
    # half the physical VMEM: 64 MiB on v5e/v6e (128 MiB parts), 32 MiB on v7x.
    return min(_tpu_vmem_capacity() // 2, 96 * 1024 * 1024)


def _row_target():
    return 1024 if _tpu_vmem_capacity() >= 100 * 1024 * 1024 else 512


def _cparams(n_parallel_axes=1):
    return pltpu.CompilerParams(
        dimension_semantics=("parallel",) * n_parallel_axes,
        vmem_limit_bytes=_vmem_limit_bytes(),
    )


def _pick_row_tile(n, target, mult=16):
    """Largest divisor of n that is <= target (preferring multiples of `mult`)."""
    if n <= target:
        return n
    for m in (mult, 8, 1):
        best = 0
        for d in range(1, int(math.isqrt(n)) + 1):
            if n % d == 0:
                for c in (d, n // d):
                    if c <= target and c % m == 0 and c > best:
                        best = c
        if best:
            return best
    # TODO(synk): pad n up to a tileable size instead of one monolithic block.
    return n


def _pick_groups(width_out, tokens_per_image):
    """How many tokens to pack per row so output rows are 128-lane dense."""
    if width_out < 128 and 128 % width_out == 0:
        g = 128 // width_out
        if tokens_per_image % g == 0:
            return g
    return 1


# --------------------------------------------------------------------------
# Kernel 1: PatchEmbed = (patches @ W_bd + b) -> per-token LayerNorm -> + pos
#           (G tokens packed per row; LN stats via block-diag group-avg matmul)
# --------------------------------------------------------------------------
def _linear_ln_pos_kernel(x_ref, w_ref, b_ref, g_ref, bt_ref, pos_ref, avg_ref,
                          o_ref):
    y = jnp.dot(x_ref[...], w_ref[...],
                preferred_element_type=jnp.float32) + b_ref[...]
    a = avg_ref[...]                                    # block-diag group mean
    mean = jnp.dot(y, a, preferred_element_type=jnp.float32)
    var = jnp.dot(jnp.square(y - mean), a, preferred_element_type=jnp.float32)
    yn = (y - mean) * jax.lax.rsqrt(var + 1e-5)
    o_ref[...] = (yn * g_ref[...] + bt_ref[...] + pos_ref[...]).astype(o_ref.dtype)


def fused_linear_ln_call(xw, w_bd, b_pk, g_pk, beta_pk, pos_b, avg):
    m_rows, k_w = xw.shape
    n_w = w_bd.shape[1]
    tm = _pick_row_tile(m_rows, _row_target(), 16)
    return pl.pallas_call(
        _linear_ln_pos_kernel,
        out_shape=jax.ShapeDtypeStruct((m_rows, n_w), jnp.bfloat16),
        grid=(m_rows // tm,),
        in_specs=[
            pl.BlockSpec((tm, k_w), lambda i: (i, 0)),    # packed patch rows (bf16)
            pl.BlockSpec((k_w, n_w), lambda i: (0, 0)),   # block-diag W (bf16)
            pl.BlockSpec((1, n_w), lambda i: (0, 0)),     # bias (tiled)
            pl.BlockSpec((1, n_w), lambda i: (0, 0)),     # LN gamma (tiled)
            pl.BlockSpec((1, n_w), lambda i: (0, 0)),     # LN beta (tiled)
            pl.BlockSpec((tm, n_w), lambda i: (i, 0)),    # pos embed rows
            pl.BlockSpec((n_w, n_w), lambda i: (0, 0)),   # group-avg matrix
        ],
        out_specs=pl.BlockSpec((tm, n_w), lambda i: (i, 0)),
        compiler_params=_cparams(1),
    )(xw, w_bd, b_pk, g_pk, beta_pk, pos_b, avg)


# --------------------------------------------------------------------------
# Kernel 2: PatchMerging = per-token LayerNorm(4C) -> Linear(4C -> 2C, no bias)
#           (same token packing; input already quadrant-concatenated)
# --------------------------------------------------------------------------
def _ln_linear_kernel(x_ref, g_ref, bt_ref, avg_ref, w_ref, o_ref):
    x = x_ref[...].astype(jnp.float32)
    a = avg_ref[...]
    mean = jnp.dot(x, a, preferred_element_type=jnp.float32)
    var = jnp.dot(jnp.square(x - mean), a, preferred_element_type=jnp.float32)
    xn = (x - mean) * jax.lax.rsqrt(var + 1e-5)
    xn = xn * g_ref[...] + bt_ref[...]
    o_ref[...] = jnp.dot(xn.astype(jnp.bfloat16), w_ref[...],
                         preferred_element_type=jnp.float32).astype(o_ref.dtype)


def fused_ln_linear_call(xcat, g_pk, beta_pk, avg, w_bd):
    m_rows, k_w = xcat.shape
    n_w = w_bd.shape[1]
    tm = _pick_row_tile(m_rows, _row_target(), 16)
    return pl.pallas_call(
        _ln_linear_kernel,
        out_shape=jax.ShapeDtypeStruct((m_rows, n_w), jnp.bfloat16),
        grid=(m_rows // tm,),
        in_specs=[
            pl.BlockSpec((tm, k_w), lambda i: (i, 0)),    # packed merged tokens (bf16)
            pl.BlockSpec((1, k_w), lambda i: (0, 0)),     # LN gamma (permuted+tiled)
            pl.BlockSpec((1, k_w), lambda i: (0, 0)),     # LN beta
            pl.BlockSpec((k_w, k_w), lambda i: (0, 0)),   # group-avg matrix
            pl.BlockSpec((k_w, n_w), lambda i: (0, 0)),   # block-diag W (bf16)
        ],
        out_specs=pl.BlockSpec((tm, n_w), lambda i: (i, 0)),
        compiler_params=_cparams(1),
    )(xcat, g_pk, beta_pk, avg, w_bd)


# --------------------------------------------------------------------------
# Kernel 3: AttentionBasedGlobalPooling + classification head (per batch elem)
# --------------------------------------------------------------------------
def _attn_pool_head_kernel(gamma_ref, x_ref, wq_ref, bq_ref, wh_ref, bh_ref,
                           o_ref, *, alpha, dim):
    x = x_ref[0].astype(jnp.float32)                      # (N, C)
    gamma = jnp.clip(gamma_ref[...], 1e-7, 100.0)         # (1, 1) runtime param

    # GeM pooling: runtime gamma used for both the power and the root.
    xc = jnp.maximum(x, 1e-7)
    xg = jnp.exp(gamma * jnp.log(xc))
    pooled = jnp.mean(xg, axis=0, keepdims=True)          # (1, C)
    pooled = jnp.exp(jnp.log(pooled) / gamma)

    # query projection (MXU, bf16 weights, f32 accumulate)
    dq = jnp.dot(pooled.astype(jnp.bfloat16), wq_ref[...],
                 preferred_element_type=jnp.float32) + bq_ref[...]   # (1, C)

    # attention over spatial tokens (softmax along N); N is tiny here.
    # TODO(synk): for large N route these O(N*C) reductions through the MXU.
    scores = jnp.sum(x * dq, axis=-1, keepdims=True) * (1.0 / math.sqrt(dim))
    m = jnp.max(scores, axis=0, keepdims=True)
    e = jnp.exp(scores - m)
    att = e / jnp.sum(e, axis=0, keepdims=True)
    weighted = jnp.sum(att * x, axis=0, keepdims=True)               # (1, C)

    # f_alpha^{-1}
    if float(alpha) == 1.0:
        out = jnp.exp(weighted)
    elif float(alpha).is_integer() and alpha >= 1.0:
        out = weighted
        for _ in range(int(alpha) - 1):
            out = out * weighted                        # matches torch pow(int)
    else:
        # TODO(synk): torch pow(negative, non-integer) -> NaN; mirrored here.
        out = jnp.exp(alpha * jnp.log(weighted))

    # L2 normalize over features
    nrm = jnp.sqrt(jnp.sum(out * out, axis=-1, keepdims=True))
    out = out / jnp.maximum(nrm, 1e-12)

    # classification head
    o_ref[0] = jnp.dot(out.astype(jnp.bfloat16), wh_ref[...],
                       preferred_element_type=jnp.float32) + bh_ref[...]


def attn_pool_head_call(tok, gamma, wq_t, bq, wh_t, bh, *, alpha):
    B, N, C = tok.shape
    NC = wh_t.shape[1]
    kern = partial(_attn_pool_head_kernel, alpha=alpha, dim=C)
    out = pl.pallas_call(
        kern,
        out_shape=jax.ShapeDtypeStruct((B, 1, NC), jnp.float32),
        grid=(B,),
        in_specs=[
            pl.BlockSpec((1, 1), lambda b: (0, 0)),          # gamma
            pl.BlockSpec((1, N, C), lambda b: (b, 0, 0)),    # tokens (bf16)
            pl.BlockSpec((C, C), lambda b: (0, 0)),          # Wq^T (bf16)
            pl.BlockSpec((1, C), lambda b: (0, 0)),          # bq
            pl.BlockSpec((C, NC), lambda b: (0, 0)),         # Wh^T (bf16)
            pl.BlockSpec((1, NC), lambda b: (0, 0)),         # bh
        ],
        out_specs=pl.BlockSpec((1, 1, NC), lambda b: (b, 0, 0)),
        compiler_params=_cparams(1),
    )(gamma, tok, wq_t, bq, wh_t, bh)
    # TODO(synk): for large spatial N (or v7x with tiny B) add a second
    # 'arbitrary' grid axis over N with an online-softmax / running-GeM
    # accumulator so both TensorCores stay busy and the (N, C) block stays
    # within the scoped VMEM budget.
    return out.reshape(B, NC)


# --------------------------------------------------------------------------
# Parameter construction (deterministic, synthetic) + packing for the kernels.
# --------------------------------------------------------------------------
def build_model(key, *, img_size, patch_size, in_chans, embed_dim0, num_stages,
                num_classes, gamma, alpha):
    P, Cin, E0 = patch_size, in_chans, embed_dim0
    Hp = img_size // P
    Np = Hp * Hp
    K = Cin * P * P

    k_pe, k_pos, k_q, k_h, k_merge = jax.random.split(key, 5)
    merge_keys = jax.random.split(k_merge, max(num_stages - 1, 1))

    # ---- PatchEmbed (Conv2d kernel=stride=P == Linear over flattened patch) ----
    w_pe = jax.random.normal(k_pe, (K, E0), jnp.float32) * math.sqrt(2.0 / (E0 * P * P))
    b_pe = jnp.zeros((1, E0), jnp.float32)
    g_pe = jnp.ones((1, E0), jnp.float32)
    beta_pe = jnp.zeros((1, E0), jnp.float32)
    pos = jax.random.normal(k_pos, (Np, E0), jnp.float32) * 0.02

    Ge = _pick_groups(E0, Np)
    pe = {
        "w_bd": block_diag(*([w_pe] * Ge)).astype(jnp.bfloat16),
        "b_pk": jnp.tile(b_pe, (1, Ge)),
        "g_pk": jnp.tile(g_pe, (1, Ge)),
        "beta_pk": jnp.tile(beta_pe, (1, Ge)),
        "pos_pk": pos.reshape(Np // Ge, Ge * E0),
        "avg": block_diag(*([jnp.full((E0, E0), 1.0 / E0, jnp.float32)] * Ge)),
    }

    # ---- PatchMerging params for stages 1..num_stages-1 (channels double) ----
    merges = []
    merge_groups = []
    C = E0
    Hc = Hp
    for s in range(1, num_stages):
        g = jnp.ones((1, 4 * C), jnp.float32)
        bt = jnp.zeros((1, 4 * C), jnp.float32)
        w = jax.random.normal(merge_keys[s - 1], (4 * C, 2 * C), jnp.float32) * 0.02
        # The quadrant regroup in the forward produces feature-block order
        # [x0, x2, x1, x3]; permute the PyTorch-order [x0,x1,x2,x3] params to match.
        perm = jnp.concatenate([jnp.arange(0, C), jnp.arange(2 * C, 3 * C),
                                jnp.arange(C, 2 * C), jnp.arange(3 * C, 4 * C)])
        g_p, bt_p, w_p = g[:, perm], bt[:, perm], w[perm, :]
        Hc = Hc // 2
        Gm = _pick_groups(2 * C, Hc * Hc)
        merges.append({
            "g_pk": jnp.tile(g_p, (1, Gm)),
            "beta_pk": jnp.tile(bt_p, (1, Gm)),
            "w_bd": block_diag(*([w_p] * Gm)).astype(jnp.bfloat16),
            "avg": block_diag(*([jnp.full((4 * C, 4 * C), 1.0 / (4 * C),
                                          jnp.float32)] * Gm)),
        })
        merge_groups.append(Gm)
        C = 2 * C

    num_features = C
    # ---- AttentionBasedGlobalPooling + head ----
    pool = {
        "gamma": jnp.full((1, 1), gamma, jnp.float32),
        "wq_t": (jax.random.normal(k_q, (num_features, num_features), jnp.float32)
                 * 0.02).astype(jnp.bfloat16),
        "bq": jnp.zeros((1, num_features), jnp.float32),
        # (the module's attention_weights parameter is unused in its forward)
        "wh_t": (jax.random.normal(k_h, (num_features, num_classes), jnp.float32)
                 * 0.02).astype(jnp.bfloat16),
        "bh": jnp.zeros((1, num_classes), jnp.float32),
    }

    params = {"pe": pe, "merge": merges, "pool": pool}
    cfg = {
        "patch_size": patch_size,
        "num_stages": num_stages,
        "embed_dim0": E0,
        "pe_groups": Ge,
        "merge_groups": tuple(merge_groups),
        "alpha": float(alpha),
        "num_features": num_features,
    }
    return params, cfg


# --------------------------------------------------------------------------
# Full forward
# --------------------------------------------------------------------------
def ultron_forward(x, params, cfg):
    P = cfg["patch_size"]
    B, Cin, H, W = x.shape
    Hp, Wp = H // P, W // P
    Np = Hp * Wp
    E0 = cfg["embed_dim0"]
    Ge = cfg["pe_groups"]

    # Patch extraction (XLA glue). bf16 first so the copy writes half the bytes;
    # flattened feature order (cin, kh, kw) matches Conv2d weight flattening.
    xb = x.astype(jnp.bfloat16)
    xp = (xb.reshape(B, Cin, Hp, P, Wp, P)
            .transpose(0, 2, 4, 1, 3, 5)
            .reshape(B * Np // Ge, Ge * Cin * P * P))     # Ge tokens per row

    pe = params["pe"]
    pos_b = jnp.tile(pe["pos_pk"], (B, 1))                # tiny (~KBs)
    tok = fused_linear_ln_call(xp, pe["w_bd"], pe["b_pk"], pe["g_pk"],
                               pe["beta_pk"], pos_b, pe["avg"])
    tok = tok.reshape(B, Np, E0)                          # bf16 tokens

    Hc, Wc, C = Hp, Wp, E0
    for s in range(cfg["num_stages"]):
        # TODO(synk): CDConvBlock / SCALABlock sources were not provided with
        # the module; the stage blocks are identity here.
        if s > 0:
            m = params["merge"][s - 1]
            Gm = cfg["merge_groups"][s - 1]
            # Quadrant regroup as ONE bf16 transpose; feature-block order is
            # [x0, x2, x1, x3] and the merge params were pre-permuted to match.
            # TODO(synk): when C % 128 == 0 this gather could be folded into the
            # merging kernel's BlockSpecs (two quadrant streams) to remove the
            # XLA round trip entirely.
            xg = (tok.reshape(B, Hc // 2, 2, Wc // 2, 2, C)
                     .transpose(0, 1, 3, 2, 4, 5))
            Hc, Wc = Hc // 2, Wc // 2
            rows = B * Hc * Wc
            xcat = xg.reshape(rows // Gm, Gm * 4 * C)
            tok = fused_ln_linear_call(xcat, m["g_pk"], m["beta_pk"],
                                       m["avg"], m["w_bd"])
            C = 2 * C
            tok = tok.reshape(B, Hc * Wc, C)

    pool = params["pool"]
    logits = attn_pool_head_call(tok, pool["gamma"], pool["wq_t"], pool["bq"],
                                 pool["wh_t"], pool["bh"], alpha=cfg["alpha"])
    return logits


# --------------------------------------------------------------------------
if __name__ == "__main__":
    # small config consistent with the module's forward:
    # img 64, patch 4, 3 input channels, 4 stages, base embed dim 16, 10 classes
    IMG, PATCH, CIN, NCLS, NSTAGES, E0 = 64, 4, 3, 10, 4, 16
    GAMMA, ALPHA = 2.0, 2.0

    key = jax.random.PRNGKey(0)
    kx, kp = jax.random.split(key)
    x = jax.random.normal(kx, (2, CIN, IMG, IMG), jnp.float32)   # NCHW like PyTorch

    params, cfg = build_model(kp, img_size=IMG, patch_size=PATCH, in_chans=CIN,
                              embed_dim0=E0, num_stages=NSTAGES,
                              num_classes=NCLS, gamma=GAMMA, alpha=ALPHA)

    fwd = jax.jit(partial(ultron_forward, cfg=cfg))
    out = fwd(x, params)
    jax.block_until_ready(out)
    assert out.shape == (2, NCLS)
    assert bool(jnp.all(jnp.isfinite(out)))
    print("KERNEL_OK")
</pallas_src>

<mosaic_0001>
module attributes {stable_mosaic.version = 11 : i64} {
  func.func @_linear_ln_pos_kernel(%arg0: i32, %arg1: memref<64x384xbf16, #tpu.memory_space<vmem>>, %arg2: memref<384x128xbf16, #tpu.memory_space<vmem>>, %arg3: memref<1x128xf32, #tpu.memory_space<vmem>>, %arg4: memref<1x128xf32, #tpu.memory_space<vmem>>, %arg5: memref<1x128xf32, #tpu.memory_space<vmem>>, %arg6: memref<64x128xf32, #tpu.memory_space<vmem>>, %arg7: memref<128x128xf32, #tpu.memory_space<vmem>>, %arg8: memref<64x128xbf16, #tpu.memory_space<vmem>>) attributes {dimension_semantics = [#tpu.dimension_semantics<parallel>], iteration_bounds = array<i64: 1>, scalar_prefetch = 0 : i64, scratch_operands = 0 : i64, tpu.core_type = #tpu.core_type<tc>, window_params = [{transform_indices = @transform_0, window_bounds = array<i64: 64, 384>}, {pipeline_mode = #tpu.pipeline_mode<synchronous>, transform_indices = @transform_1, window_bounds = array<i64: 384, 128>}, {pipeline_mode = #tpu.pipeline_mode<synchronous>, transform_indices = @transform_2, window_bounds = array<i64: 1, 128>}, {pipeline_mode = #tpu.pipeline_mode<synchronous>, transform_indices = @transform_3, window_bounds = array<i64: 1, 128>}, {pipeline_mode = #tpu.pipeline_mode<synchronous>, transform_indices = @transform_4, window_bounds = array<i64: 1, 128>}, {transform_indices = @transform_5, window_bounds = array<i64: 64, 128>}, {pipeline_mode = #tpu.pipeline_mode<synchronous>, transform_indices = @transform_6, window_bounds = array<i64: 128, 128>}, {transform_indices = @transform_7, window_bounds = array<i64: 64, 128>}]} {
    %c0 = arith.constant 0 : index
    %c0_0 = arith.constant 0 : index
    %0 = vector.load %arg1[%c0, %c0_0] : memref<64x384xbf16, #tpu.memory_space<vmem>>, vector<64x384xbf16>
    %c0_1 = arith.constant 0 : index
    %c0_2 = arith.constant 0 : index
    %1 = vector.load %arg2[%c0_1, %c0_2] : memref<384x128xbf16, #tpu.memory_space<vmem>>, vector<384x128xbf16>
    %cst = arith.constant dense<0.000000e+00> : vector<64x128xf32>
    %2 = tpu.matmul %0, %1, %cst {dimension_numbers = #tpu.dot_dimension_numbers<[1], [0], [0], [1], [0, 0, 1, 1], [], []>} : vector<64x384xbf16>, vector<384x128xbf16>, vector<64x128xf32> -> vector<64x128xf32>
    %c0_3 = arith.constant 0 : index
    %c0_4 = arith.constant 0 : index
    %3 = vector.load %arg3[%c0_3, %c0_4] : memref<1x128xf32, #tpu.memory_space<vmem>>, vector<1x128xf32>
    %4 = vector.broadcast %3 : vector<1x128xf32> to vector<64x128xf32>
    %5 = arith.addf %2, %4 : vector<64x128xf32>
    %c0_5 = arith.constant 0 : index
    %c0_6 = arith.constant 0 : index
    %6 = vector.load %arg7[%c0_5, %c0_6] : memref<128x128xf32, #tpu.memory_space<vmem>>, vector<128x128xf32>
    %cst_7 = arith.constant dense<0.000000e+00> : vector<64x128xf32>
    %7 = tpu.matmul %5, %6, %cst_7 {dimension_numbers = #tpu.dot_dimension_numbers<[1], [0], [0], [1], [0, 0, 1, 1], [], []>} : vector<64x128xf32>, vector<128x128xf32>, vector<64x128xf32> -> vector<64x128xf32>
    %8 = arith.subf %5, %7 : vector<64x128xf32>
    %9 = arith.mulf %8, %8 : vector<64x128xf32>
    %cst_8 = arith.constant dense<0.000000e+00> : vector<64x128xf32>
    %10 = tpu.matmul %9, %6, %cst_8 {dimension_numbers = #tpu.dot_dimension_numbers<[1], [0], [0], [1], [0, 0, 1, 1], [], []>} : vector<64x128xf32>, vector<128x128xf32>, vector<64x128xf32> -> vector<64x128xf32>
    %11 = arith.subf %5, %7 : vector<64x128xf32>
    %cst_9 = arith.constant 9.99999974E-6 : f32
    %12 = vector.broadcast %cst_9 : f32 to vector<64x128xf32>
    %13 = arith.addf %10, %12 : vector<64x128xf32>
    %14 = math.rsqrt %13 : vector<64x128xf32>
    %15 = arith.mulf %11, %14 : vector<64x128xf32>
    %c0_10 = arith.constant 0 : index
    %c0_11 = arith.constant 0 : index
    %16 = vector.load %arg4[%c0_10, %c0_11] : memref<1x128xf32, #tpu.memory_space<vmem>>, vector<1x128xf32>
    %17 = vector.broadcast %16 : vector<1x128xf32> to vector<64x128xf32>
    %18 = arith.mulf %15, %17 : vector<64x128xf32>
    %c0_12 = arith.constant 0 : index
    %c0_13 = arith.constant 0 : index
    %19 = vector.load %arg5[%c0_12, %c0_13] : memref<1x128xf32, #tpu.memory_space<vmem>>, vector<1x128xf32>
    %20 = vector.broadcast %19 : vector<1x128xf32> to vector<64x128xf32>
    %21 = arith.addf %18, %20 : vector<64x128xf32>
    %c0_14 = arith.constant 0 : index
    %c0_15 = arith.constant 0 : index
    %22 = vector.load %arg6[%c0_14, %c0_15] : memref<64x128xf32, #tpu.memory_space<vmem>>, vector<64x128xf32>
    %23 = arith.addf %21, %22 : vector<64x128xf32>
    %24 = arith.truncf %23 : vector<64x128xf32> to vector<64x128xbf16>
    %c0_16 = arith.constant 0 : index
    %c0_17 = arith.constant 0 : index
    %25 = vector.load %arg8[%c0_16, %c0_17] : memref<64x128xbf16, #tpu.memory_space<vmem>>, vector<64x128xbf16>
    tpu.vector_store %arg8[%c0_16, %c0_17], %24 {strides = array<i32>} : memref<64x128xbf16, #tpu.memory_space<vmem>>, vector<64x128xbf16>,
    return
  }
  func.func @transform_0(%arg0: i32) -> (i32, i32) {
    %c0_i32 = arith.constant 0 : i32
    %c0_i32_0 = arith.constant 0 : i32
    return %arg0, %c0_i32 : i32, i32
  }
  func.func @transform_1(%arg0: i32) -> (i32, i32) {
    %c0_i32 = arith.constant 0 : i32
    %c0_i32_0 = arith.constant 0 : i32
    %c0_i32_1 = arith.constant 0 : i32
    return %c0_i32, %c0_i32_0 : i32, i32
  }
  func.func @transform_2(%arg0: i32) -> (i32, i32) {
    %c0_i32 = arith.constant 0 : i32
    %c0_i32_0 = arith.constant 0 : i32
    %c0_i32_1 = arith.constant 0 : i32
    return %c0_i32, %c0_i32_0 : i32, i32
  }
  func.func @transform_3(%arg0: i32) -> (i32, i32) {
    %c0_i32 = arith.constant 0 : i32
    %c0_i32_0 = arith.constant 0 : i32
    %c0_i32_1 = arith.constant 0 : i32
    return %c0_i32, %c0_i32_0 : i32, i32
  }
  func.func @transform_4(%arg0: i32) -> (i32, i32) {
    %c0_i32 = arith.constant 0 : i32
    %c0_i32_0 = arith.constant 0 : i32
    %c0_i32_1 = arith.constant 0 : i32
    return %c0_i32, %c0_i32_0 : i32, i32
  }
  func.func @transform_5(%arg0: i32) -> (i32, i32) {
    %c0_i32 = arith.constant 0 : i32
    %c0_i32_0 = arith.constant 0 : i32
    return %arg0, %c0_i32 : i32, i32
  }
  func.func @transform_6(%arg0: i32) -> (i32, i32) {
    %c0_i32 = arith.constant 0 : i32
    %c0_i32_0 = arith.constant 0 : i32
    %c0_i32_1 = arith.constant 0 : i32
    return %c0_i32, %c0_i32_0 : i32, i32
  }
  func.func @transform_7(%arg0: i32) -> (i32, i32) {
    %c0_i32 = arith.constant 0 : i32
    %c0_i32_0 = arith.constant 0 : i32
    return %arg0, %c0_i32 : i32, i32
  }
}

module attributes {stable_mosaic.version = 11 : i64} {
  func.func @_ln_linear_kernel(%arg0: i32, %arg1: memref<32x256xbf16, #tpu.memory_space<vmem>>, %arg2: memref<1x256xf32, #tpu.memory_space<vmem>>, %arg3: memref<1x256xf32, #tpu.memory_space<vmem>>, %arg4: memref<256x256xf32, #tpu.memory_space<vmem>>, %arg5: memref<256x128xbf16, #tpu.memory_space<vmem>>, %arg6: memref<32x128xbf16, #tpu.memory_space<vmem>>) attributes {dimension_semantics = [#tpu.dimension_semantics<parallel>], iteration_bounds = array<i64: 1>, scalar_prefetch = 0 : i64, scratch_operands = 0 : i64, tpu.core_type = #tpu.core_type<tc>, window_params = [{transform_indices = @transform_0, window_bounds = array<i64: 32, 256>}, {pipeline_mode = #tpu.pipeline_mode<synchronous>, transform_indices = @transform_1, window_bounds = array<i64: 1, 256>}, {pipeline_mode = #tpu.pipeline_mode<synchronous>, transform_indices = @transform_2, window_bounds = array<i64: 1, 256>}, {pipeline_mode = #tpu.pipeline_mode<synchronous>, transform_indices = @transform_3, window_bounds = array<i64: 256, 256>}, {pipeline_mode = #tpu.pipeline_mode<synchronous>, transform_indices = @transform_4, window_bounds = array<i64: 256, 128>}, {transform_indices = @transform_5, window_bounds = array<i64: 32, 128>}]} {
    %c0 = arith.constant 0 : index
    %c0_0 = arith.constant 0 : index
    %0 = vector.load %arg1[%c0, %c0_0] : memref<32x256xbf16, #tpu.memory_space<vmem>>, vector<32x256xbf16>
    %1 = arith.extf %0 : vector<32x256xbf16> to vector<32x256xf32>
    %c0_1 = arith.constant 0 : index
    %c0_2 = arith.constant 0 : index
    %2 = vector.load %arg4[%c0_1, %c0_2] : memref<256x256xf32, #tpu.memory_space<vmem>>, vector<256x256xf32>
    %cst = arith.constant dense<0.000000e+00> : vector<32x256xf32>
    %3 = tpu.matmul %1, %2, %cst {dimension_numbers = #tpu.dot_dimension_numbers<[1], [0], [0], [1], [0, 0, 1, 1], [], []>} : vector<32x256xf32>, vector<256x256xf32>, vector<32x256xf32> -> vector<32x256xf32>
    %4 = arith.subf %1, %3 : vector<32x256xf32>
    %5 = arith.mulf %4, %4 : vector<32x256xf32>
    %cst_3 = arith.constant dense<0.000000e+00> : vector<32x256xf32>
    %6 = tpu.matmul %5, %2, %cst_3 {dimension_numbers = #tpu.dot_dimension_numbers<[1], [0], [0], [1], [0, 0, 1, 1], [], []>} : vector<32x256xf32>, vector<256x256xf32>, vector<32x256xf32> -> vector<32x256xf32>
    %7 = arith.subf %1, %3 : vector<32x256xf32>
    %cst_4 = arith.constant 9.99999974E-6 : f32
    %8 = vector.broadcast %cst_4 : f32 to vector<32x256xf32>
    %9 = arith.addf %6, %8 : vector<32x256xf32>
    %10 = math.rsqrt %9 : vector<32x256xf32>
    %11 = arith.mulf %7, %10 : vector<32x256xf32>
    %c0_5 = arith.constant 0 : index
    %c0_6 = arith.constant 0 : index
    %12 = vector.load %arg2[%c0_5, %c0_6] : memref<1x256xf32, #tpu.memory_space<vmem>>, vector<1x256xf32>
    %13 = vector.broadcast %12 : vector<1x256xf32> to vector<32x256xf32>
    %14 = arith.mulf %11, %13 : vector<32x256xf32>
    %c0_7 = arith.constant 0 : index
    %c0_8 = arith.constant 0 : index
    %15 = vector.load %arg3[%c0_7, %c0_8] : memref<1x256xf32, #tpu.memory_space<vmem>>, vector<1x256xf32>
    %16 = vector.broadcast %15 : vector<1x256xf32> to vector<32x256xf32>
    %17 = arith.addf %14, %16 : vector<32x256xf32>
    %18 = arith.truncf %17 : vector<32x256xf32> to vector<32x256xbf16>
    %c0_9 = arith.constant 0 : index
    %c0_10 = arith.constant 0 : index
    %19 = vector.load %arg5[%c0_9, %c0_10] : memref<256x128xbf16, #tpu.memory_space<vmem>>, vector<256x128xbf16>
    %cst_11 = arith.constant dense<0.000000e+00> : vector<32x128xf32>
    %20 = tpu.matmul %18, %19, %cst_11 {dimension_numbers = #tpu.dot_dimension_numbers<[1], [0], [0], [1], [0, 0, 1, 1], [], []>} : vector<32x256xbf16>, vector<256x128xbf16>, vector<32x128xf32> -> vector<32x128xf32>
    %21 = arith.truncf %20 : vector<32x128xf32> to vector<32x128xbf16>
    %c0_12 = arith.constant 0 : index
    %c0_13 = arith.constant 0 : index
    %22 = vector.load %arg6[%c0_12, %c0_13] : memref<32x128xbf16, #tpu.memory_space<vmem>>, vector<32x128xbf16>
    tpu.vector_store %arg6[%c0_12, %c0_13], %21 {strides = array<i32>} : memref<32x128xbf16, #tpu.memory_space<vmem>>, vector<32x128xbf16>,
    return
  }
  func.func @transform_0(%arg0: i32) -> (i32, i32) {
    %c0_i32 = arith.constant 0 : i32
    %c0_i32_0 = arith.constant 0 : i32
    return %arg0, %c0_i32 : i32, i32
  }
  func.func @transform_1(%arg0: i32) -> (i32, i32) {
    %c0_i32 = arith.constant 0 : i32
    %c0_i32_0 = arith.constant 0 : i32
    %c0_i32_1 = arith.constant 0 : i32
    return %c0_i32, %c0_i32_0 : i32, i32
  }
  func.func @transform_2(%arg0: i32) -> (i32, i32) {
    %c0_i32 = arith.constant 0 : i32
    %c0_i32_0 = arith.constant 0 : i32
    %c0_i32_1 = arith.constant 0 : i32
    return %c0_i32, %c0_i32_0 : i32, i32
  }
  func.func @transform_3(%arg0: i32) -> (i32, i32) {
    %c0_i32 = arith.constant 0 : i32
    %c0_i32_0 = arith.constant 0 : i32
    %c0_i32_1 = arith.constant 0 : i32
    return %c0_i32, %c0_i32_0 : i32, i32
  }
  func.func @transform_4(%arg0: i32) -> (i32, i32) {
    %c0_i32 = arith.constant 0 : i32
    %c0_i32_0 = arith.constant 0 : i32
    %c0_i32_1 = arith.constant 0 : i32
    return %c0_i32, %c0_i32_0 : i32, i32
  }
  func.func @transform_5(%arg0: i32) -> (i32, i32) {
    %c0_i32 = arith.constant 0 : i32
    %c0_i32_0 = arith.constant 0 : i32
    return %arg0, %c0_i32 : i32, i32
  }
}

module attributes {stable_mosaic.version = 11 : i64} {
  func.func @_ln_linear_kernel(%arg0: i32, %arg1: memref<16x256xbf16, #tpu.memory_space<vmem>>, %arg2: memref<1x256xf32, #tpu.memory_space<vmem>>, %arg3: memref<1x256xf32, #tpu.memory_space<vmem>>, %arg4: memref<256x256xf32, #tpu.memory_space<vmem>>, %arg5: memref<256x128xbf16, #tpu.memory_space<vmem>>, %arg6: memref<16x128xbf16, #tpu.memory_space<vmem>>) attributes {dimension_semantics = [#tpu.dimension_semantics<parallel>], iteration_bounds = array<i64: 1>, scalar_prefetch = 0 : i64, scratch_operands = 0 : i64, tpu.core_type = #tpu.core_type<tc>, window_params = [{transform_indices = @transform_0, window_bounds = array<i64: 16, 256>}, {pipeline_mode = #tpu.pipeline_mode<synchronous>, transform_indices = @transform_1, window_bounds = array<i64: 1, 256>}, {pipeline_mode = #tpu.pipeline_mode<synchronous>, transform_indices = @transform_2, window_bounds = array<i64: 1, 256>}, {pipeline_mode = #tpu.pipeline_mode<synchronous>, transform_indices = @transform_3, window_bounds = array<i64: 256, 256>}, {pipeline_mode = #tpu.pipeline_mode<synchronous>, transform_indices = @transform_4, window_bounds = array<i64: 256, 128>}, {transform_indices = @transform_5, window_bounds = array<i64: 16, 128>}]} {
    %c0 = arith.constant 0 : index
    %c0_0 = arith.constant 0 : index
    %0 = vector.load %arg1[%c0, %c0_0] : memref<16x256xbf16, #tpu.memory_space<vmem>>, vector<16x256xbf16>
    %1 = arith.extf %0 : vector<16x256xbf16> to vector<16x256xf32>
    %c0_1 = arith.constant 0 : index
    %c0_2 = arith.constant 0 : index
    %2 = vector.load %arg4[%c0_1, %c0_2] : memref<256x256xf32, #tpu.memory_space<vmem>>, vector<256x256xf32>
    %cst = arith.constant dense<0.000000e+00> : vector<16x256xf32>
    %3 = tpu.matmul %1, %2, %cst {dimension_numbers = #tpu.dot_dimension_numbers<[1], [0], [0], [1], [0, 0, 1, 1], [], []>} : vector<16x256xf32>, vector<256x256xf32>, vector<16x256xf32> -> vector<16x256xf32>
    %4 = arith.subf %1, %3 : vector<16x256xf32>
    %5 = arith.mulf %4, %4 : vector<16x256xf32>
    %cst_3 = arith.constant dense<0.000000e+00> : vector<16x256xf32>
    %6 = tpu.matmul %5, %2, %cst_3 {dimension_numbers = #tpu.dot_dimension_numbers<[1], [0], [0], [1], [0, 0, 1, 1], [], []>} : vector<16x256xf32>, vector<256x256xf32>, vector<16x256xf32> -> vector<16x256xf32>
    %7 = arith.subf %1, %3 : vector<16x256xf32>
    %cst_4 = arith.constant 9.99999974E-6 : f32
    %8 = vector.broadcast %cst_4 : f32 to vector<16x256xf32>
    %9 = arith.addf %6, %8 : vector<16x256xf32>
    %10 = math.rsqrt %9 : vector<16x256xf32>
    %11 = arith.mulf %7, %10 : vector<16x256xf32>
    %c0_5 = arith.constant 0 : index
    %c0_6 = arith.constant 0 : index
    %12 = vector.load %arg2[%c0_5, %c0_6] : memref<1x256xf32, #tpu.memory_space<vmem>>, vector<1x256xf32>
    %13 = vector.broadcast %12 : vector<1x256xf32> to vector<16x256xf32>
    %14 = arith.mulf %11, %13 : vector<16x256xf32>
    %c0_7 = arith.constant 0 : index
    %c0_8 = arith.constant 0 : index
    %15 = vector.load %arg3[%c0_7, %c0_8] : memref<1x256xf32, #tpu.memory_space<vmem>>, vector<1x256xf32>
    %16 = vector.broadcast %15 : vector<1x256xf32> to vector<16x256xf32>
    %17 = arith.addf %14, %16 : vector<16x256xf32>
    %18 = arith.truncf %17 : vector<16x256xf32> to vector<16x256xbf16>
    %c0_9 = arith.constant 0 : index
    %c0_10 = arith.constant 0 : index
    %19 = vector.load %arg5[%c0_9, %c0_10] : memref<256x128xbf16, #tpu.memory_space<vmem>>, vector<256x128xbf16>
    %cst_11 = arith.constant dense<0.000000e+00> : vector<16x128xf32>
    %20 = tpu.matmul %18, %19, %cst_11 {dimension_numbers = #tpu.dot_dimension_numbers<[1], [0], [0], [1], [0, 0, 1, 1], [], []>} : vector<16x256xbf16>, vector<256x128xbf16>, vector<16x128xf32> -> vector<16x128xf32>
    %21 = arith.truncf %20 : vector<16x128xf32> to vector<16x128xbf16>
    %c0_12 = arith.constant 0 : index
    %c0_13 = arith.constant 0 : index
    %22 = vector.load %arg6[%c0_12, %c0_13] : memref<16x128xbf16, #tpu.memory_space<vmem>>, vector<16x128xbf16>
    tpu.vector_store %arg6[%c0_12, %c0_13], %21 {strides = array<i32>} : memref<16x128xbf16, #tpu.memory_space<vmem>>, vector<16x128xbf16>,
    return
  }
  func.func @transform_0(%arg0: i32) -> (i32, i32) {
    %c0_i32 = arith.constant 0 : i32
    %c0_i32_0 = arith.constant 0 : i32
    return %arg0, %c0_i32 : i32, i32
  }
  func.func @transform_1(%arg0: i32) -> (i32, i32) {
    %c0_i32 = arith.constant 0 : i32
    %c0_i32_0 = arith.constant 0 : i32
    %c0_i32_1 = arith.constant 0 : i32
    return %c0_i32, %c0_i32_0 : i32, i32
  }
  func.func @transform_2(%arg0: i32) -> (i32, i32) {
    %c0_i32 = arith.constant 0 : i32
    %c0_i32_0 = arith.constant 0 : i32
    %c0_i32_1 = arith.constant 0 : i32
    return %c0_i32, %c0_i32_0 : i32, i32
  }
  func.func @transform_3(%arg0: i32) -> (i32, i32) {
    %c0_i32 = arith.constant 0 : i32
    %c0_i32_0 = arith.constant 0 : i32
    %c0_i32_1 = arith.constant 0 : i32
    return %c0_i32, %c0_i32_0 : i32, i32
  }
  func.func @transform_4(%arg0: i32) -> (i32, i32) {
    %c0_i32 = arith.constant 0 : i32
    %c0_i32_0 = arith.constant 0 : i32
    %c0_i32_1 = arith.constant 0 : i32
    return %c0_i32, %c0_i32_0 : i32, i32
  }
  func.func @transform_5(%arg0: i32) -> (i32, i32) {
    %c0_i32 = arith.constant 0 : i32
    %c0_i32_0 = arith.constant 0 : i32
    return %arg0, %c0_i32 : i32, i32
  }
}

module attributes {stable_mosaic.version = 11 : i64} {
  func.func @_ln_linear_kernel(%arg0: i32, %arg1: memref<8x256xbf16, #tpu.memory_space<vmem>>, %arg2: memref<1x256xf32, #tpu.memory_space<vmem>>, %arg3: memref<1x256xf32, #tpu.memory_space<vmem>>, %arg4: memref<256x256xf32, #tpu.memory_space<vmem>>, %arg5: memref<256x128xbf16, #tpu.memory_space<vmem>>, %arg6: memref<8x128xbf16, #tpu.memory_space<vmem>>) attributes {dimension_semantics = [#tpu.dimension_semantics<parallel>], iteration_bounds = array<i64: 1>, scalar_prefetch = 0 : i64, scratch_operands = 0 : i64, tpu.core_type = #tpu.core_type<tc>, window_params = [{transform_indices = @transform_0, window_bounds = array<i64: 8, 256>}, {pipeline_mode = #tpu.pipeline_mode<synchronous>, transform_indices = @transform_1, window_bounds = array<i64: 1, 256>}, {pipeline_mode = #tpu.pipeline_mode<synchronous>, transform_indices = @transform_2, window_bounds = array<i64: 1, 256>}, {pipeline_mode = #tpu.pipeline_mode<synchronous>, transform_indices = @transform_3, window_bounds = array<i64: 256, 256>}, {pipeline_mode = #tpu.pipeline_mode<synchronous>, transform_indices = @transform_4, window_bounds = array<i64: 256, 128>}, {transform_indices = @transform_5, window_bounds = array<i64: 8, 128>}]} {
    %c0 = arith.constant 0 : index
    %c0_0 = arith.constant 0 : index
    %0 = vector.load %arg1[%c0, %c0_0] : memref<8x256xbf16, #tpu.memory_space<vmem>>, vector<8x256xbf16>
    %1 = arith.extf %0 : vector<8x256xbf16> to vector<8x256xf32>
    %c0_1 = arith.constant 0 : index
    %c0_2 = arith.constant 0 : index
    %2 = vector.load %arg4[%c0_1, %c0_2] : memref<256x256xf32, #tpu.memory_space<vmem>>, vector<256x256xf32>
    %cst = arith.constant dense<0.000000e+00> : vector<8x256xf32>
    %3 = tpu.matmul %1, %2, %cst {dimension_numbers = #tpu.dot_dimension_numbers<[1], [0], [0], [1], [0, 0, 1, 1], [], []>} : vector<8x256xf32>, vector<256x256xf32>, vector<8x256xf32> -> vector<8x256xf32>
    %4 = arith.subf %1, %3 : vector<8x256xf32>
    %5 = arith.mulf %4, %4 : vector<8x256xf32>
    %cst_3 = arith.constant dense<0.000000e+00> : vector<8x256xf32>
    %6 = tpu.matmul %5, %2, %cst_3 {dimension_numbers = #tpu.dot_dimension_numbers<[1], [0], [0], [1], [0, 0, 1, 1], [], []>} : vector<8x256xf32>, vector<256x256xf32>, vector<8x256xf32> -> vector<8x256xf32>
    %7 = arith.subf %1, %3 : vector<8x256xf32>
    %cst_4 = arith.constant 9.99999974E-6 : f32
    %8 = vector.broadcast %cst_4 : f32 to vector<8x256xf32>
    %9 = arith.addf %6, %8 : vector<8x256xf32>
    %10 = math.rsqrt %9 : vector<8x256xf32>
    %11 = arith.mulf %7, %10 : vector<8x256xf32>
    %c0_5 = arith.constant 0 : index
    %c0_6 = arith.constant 0 : index
    %12 = vector.load %arg2[%c0_5, %c0_6] : memref<1x256xf32, #tpu.memory_space<vmem>>, vector<1x256xf32>
    %13 = vector.broadcast %12 : vector<1x256xf32> to vector<8x256xf32>
    %14 = arith.mulf %11, %13 : vector<8x256xf32>
    %c0_7 = arith.constant 0 : index
    %c0_8 = arith.constant 0 : index
    %15 = vector.load %arg3[%c0_7, %c0_8] : memref<1x256xf32, #tpu.memory_space<vmem>>, vector<1x256xf32>
    %16 = vector.broadcast %15 : vector<1x256xf32> to vector<8x256xf32>
    %17 = arith.addf %14, %16 : vector<8x256xf32>
    %18 = arith.truncf %17 : vector<8x256xf32> to vector<8x256xbf16>
    %c0_9 = arith.constant 0 : index
    %c0_10 = arith.constant 0 : index
    %19 = vector.load %arg5[%c0_9, %c0_10] : memref<256x128xbf16, #tpu.memory_space<vmem>>, vector<256x128xbf16>
    %cst_11 = arith.constant dense<0.000000e+00> : vector<8x128xf32>
    %20 = tpu.matmul %18, %19, %cst_11 {dimension_numbers = #tpu.dot_dimension_numbers<[1], [0], [0], [1], [0, 0, 1, 1], [], []>} : vector<8x256xbf16>, vector<256x128xbf16>, vector<8x128xf32> -> vector<8x128xf32>
    %21 = arith.truncf %20 : vector<8x128xf32> to vector<8x128xbf16>
    %c0_12 = arith.constant 0 : index
    %c0_13 = arith.constant 0 : index
    %22 = vector.load %arg6[%c0_12, %c0_13] : memref<8x128xbf16, #tpu.memory_space<vmem>>, vector<8x128xbf16>
    tpu.vector_store %arg6[%c0_12, %c0_13], %21 {strides = array<i32>} : memref<8x128xbf16, #tpu.memory_space<vmem>>, vector<8x128xbf16>,
    return
  }
  func.func @transform_0(%arg0: i32) -> (i32, i32) {
    %c0_i32 = arith.constant 0 : i32
    %c0_i32_0 = arith.constant 0 : i32
    return %arg0, %c0_i32 : i32, i32
  }
  func.func @transform_1(%arg0: i32) -> (i32, i32) {
    %c0_i32 = arith.constant 0 : i32
    %c0_i32_0 = arith.constant 0 : i32
    %c0_i32_1 = arith.constant 0 : i32
    return %c0_i32, %c0_i32_0 : i32, i32
  }
  func.func @transform_2(%arg0: i32) -> (i32, i32) {
    %c0_i32 = arith.constant 0 : i32
    %c0_i32_0 = arith.constant 0 : i32
    %c0_i32_1 = arith.constant 0 : i32
    return %c0_i32, %c0_i32_0 : i32, i32
  }
  func.func @transform_3(%arg0: i32) -> (i32, i32) {
    %c0_i32 = arith.constant 0 : i32
    %c0_i32_0 = arith.constant 0 : i32
    %c0_i32_1 = arith.constant 0 : i32
    return %c0_i32, %c0_i32_0 : i32, i32
  }
  func.func @transform_4(%arg0: i32) -> (i32, i32) {
    %c0_i32 = arith.constant 0 : i32
    %c0_i32_0 = arith.constant 0 : i32
    %c0_i32_1 = arith.constant 0 : i32
    return %c0_i32, %c0_i32_0 : i32, i32
  }
  func.func @transform_5(%arg0: i32) -> (i32, i32) {
    %c0_i32 = arith.constant 0 : i32
    %c0_i32_0 = arith.constant 0 : i32
    return %arg0, %c0_i32 : i32, i32
  }
}

module attributes {stable_mosaic.version = 11 : i64} {
  func.func @_attn_pool_head_kernel(%arg0: i32, %arg1: memref<1x1xf32, #tpu.memory_space<vmem>>, %arg2: memref<1x4x128xbf16, #tpu.memory_space<vmem>>, %arg3: memref<128x128xbf16, #tpu.memory_space<vmem>>, %arg4: memref<1x128xf32, #tpu.memory_space<vmem>>, %arg5: memref<128x10xbf16, #tpu.memory_space<vmem>>, %arg6: memref<1x10xf32, #tpu.memory_space<vmem>>, %arg7: memref<1x1x10xf32, #tpu.memory_space<vmem>>) attributes {dimension_semantics = [#tpu.dimension_semantics<parallel>], iteration_bounds = array<i64: 2>, scalar_prefetch = 0 : i64, scratch_operands = 0 : i64, tpu.core_type = #tpu.core_type<tc>, window_params = [{pipeline_mode = #tpu.pipeline_mode<synchronous>, transform_indices = @transform_0, window_bounds = array<i64: 1, 1>}, {transform_indices = @transform_1, window_bounds = array<i64: 1, 4, 128>}, {pipeline_mode = #tpu.pipeline_mode<synchronous>, transform_indices = @transform_2, window_bounds = array<i64: 128, 128>}, {pipeline_mode = #tpu.pipeline_mode<synchronous>, transform_indices = @transform_3, window_bounds = array<i64: 1, 128>}, {pipeline_mode = #tpu.pipeline_mode<synchronous>, transform_indices = @transform_4, window_bounds = array<i64: 128, 10>}, {pipeline_mode = #tpu.pipeline_mode<synchronous>, transform_indices = @transform_5, window_bounds = array<i64: 1, 10>}, {transform_indices = @transform_6, window_bounds = array<i64: 1, 1, 10>}]} {
    %c0 = arith.constant 0 : index
    %c0_0 = arith.constant 0 : index
    %c0_1 = arith.constant 0 : index
    %0 = vector.load %arg2[%c0, %c0_0, %c0_1] : memref<1x4x128xbf16, #tpu.memory_space<vmem>>, vector<1x4x128xbf16>
    %1 = vector.shape_cast %0 : vector<1x4x128xbf16> to vector<4x128xbf16>
    %2 = arith.extf %1 : vector<4x128xbf16> to vector<4x128xf32>
    %c0_2 = arith.constant 0 : index
    %c0_3 = arith.constant 0 : index
    %3 = vector.load %arg1[%c0_2, %c0_3] : memref<1x1xf32, #tpu.memory_space<vmem>>, vector<1x1xf32>
    %cst = arith.constant 1.000000e-07 : f32
    %cst_4 = arith.constant 1.000000e+02 : f32
    %4 = vector.broadcast %cst : f32 to vector<1x1xf32>
    %5 = arith.maximumf %4, %3 : vector<1x1xf32>
    %6 = vector.broadcast %cst_4 : f32 to vector<1x1xf32>
    %7 = arith.minimumf %6, %5 : vector<1x1xf32>
    %cst_5 = arith.constant 1.000000e-07 : f32
    %8 = vector.broadcast %cst_5 : f32 to vector<4x128xf32>
    %9 = arith.maximumf %2, %8 : vector<4x128xf32>
    %10 = math.log %9 : vector<4x128xf32>
    %11 = vector.broadcast %7 : vector<1x1xf32> to vector<4x128xf32>
    %12 = arith.mulf %11, %10 : vector<4x128xf32>
    %13 = math.exp %12 : vector<4x128xf32>
    %cst_6 = arith.constant dense<0.000000e+00> : vector<128xf32>
    %14 = vector.multi_reduction <add>, %13, %cst_6 [0] : vector<4x128xf32> to vector<128xf32>
    %15 = vector.shape_cast %14 : vector<128xf32> to vector<1x128xf32>
    %cst_7 = arith.constant 4.000000e+00 : f32
    %16 = vector.broadcast %cst_7 : f32 to vector<1x128xf32>
    %17 = arith.divf %15, %16 : vector<1x128xf32>
    %18 = math.log %17 : vector<1x128xf32>
    %19 = vector.broadcast %7 : vector<1x1xf32> to vector<1x128xf32>
    %20 = arith.divf %18, %19 : vector<1x128xf32>
    %21 = math.exp %20 : vector<1x128xf32>
    %22 = arith.truncf %21 : vector<1x128xf32> to vector<1x128xbf16>
    %c0_8 = arith.constant 0 : index
    %c0_9 = arith.constant 0 : index
    %23 = vector.load %arg3[%c0_8, %c0_9] : memref<128x128xbf16, #tpu.memory_space<vmem>>, vector<128x128xbf16>
    %cst_10 = arith.constant dense<0.000000e+00> : vector<1x128xf32>
    %24 = tpu.matmul %22, %23, %cst_10 {dimension_numbers = #tpu.dot_dimension_numbers<[1], [0], [0], [1], [0, 0, 1, 1], [], []>} : vector<1x128xbf16>, vector<128x128xbf16>, vector<1x128xf32> -> vector<1x128xf32>
    %c0_11 = arith.constant 0 : index
    %c0_12 = arith.constant 0 : index
    %25 = vector.load %arg4[%c0_11, %c0_12] : memref<1x128xf32, #tpu.memory_space<vmem>>, vector<1x128xf32>
    %26 = arith.addf %24, %25 : vector<1x128xf32>
    %27 = vector.broadcast %26 : vector<1x128xf32> to vector<4x128xf32>
    %28 = arith.mulf %2, %27 : vector<4x128xf32>
    %cst_13 = arith.constant dense<0.000000e+00> : vector<4xf32>
    %29 = vector.multi_reduction <add>, %28, %cst_13 [1] : vector<4x128xf32> to vector<4xf32>
    %30 = vector.shape_cast %29 : vector<4xf32> to vector<4x1xf32>
    %cst_14 = arith.constant 0.0883883461 : f32
    %31 = vector.broadcast %cst_14 : f32 to vector<4x1xf32>
    %32 = arith.mulf %30, %31 : vector<4x1xf32>
    %cst_15 = arith.constant dense<0xFF800000> : vector<1xf32>
    %33 = vector.multi_reduction <maximumf>, %32, %cst_15 [0] : vector<4x1xf32> to vector<1xf32>
    %34 = vector.shape_cast %33 : vector<1xf32> to vector<1x1xf32>
    %35 = vector.broadcast %34 : vector<1x1xf32> to vector<4x1xf32>
    %36 = arith.subf %32, %35 : vector<4x1xf32>
    %37 = math.exp %36 : vector<4x1xf32>
    %cst_16 = arith.constant dense<0.000000e+00> : vector<1xf32>
    %38 = vector.multi_reduction <add>, %37, %cst_16 [0] : vector<4x1xf32> to vector<1xf32>
    %39 = vector.shape_cast %38 : vector<1xf32> to vector<1x1xf32>
    %40 = vector.broadcast %39 : vector<1x1xf32> to vector<4x1xf32>
    %41 = arith.divf %37, %40 : vector<4x1xf32>
    %42 = vector.broadcast %41 : vector<4x1xf32> to vector<4x128xf32>
    %43 = arith.mulf %42, %2 : vector<4x128xf32>
    %cst_17 = arith.constant dense<0.000000e+00> : vector<128xf32>
    %44 = vector.multi_reduction <add>, %43, %cst_17 [0] : vector<4x128xf32> to vector<128xf32>
    %45 = vector.shape_cast %44 : vector<128xf32> to vector<1x128xf32>
    %46 = arith.mulf %45, %45 : vector<1x128xf32>
    %47 = arith.mulf %46, %46 : vector<1x128xf32>
    %cst_18 = arith.constant dense<0.000000e+00> : vector<1xf32>
    %48 = vector.multi_reduction <add>, %47, %cst_18 [1] : vector<1x128xf32> to vector<1xf32>
    %49 = vector.shape_cast %48 : vector<1xf32> to vector<1x1xf32>
    %50 = math.sqrt %49 : vector<1x1xf32>
    %cst_19 = arith.constant 9.99999996E-13 : f32
    %51 = vector.broadcast %cst_19 : f32 to vector<1x1xf32>
    %52 = arith.maximumf %50, %51 : vector<1x1xf32>
    %53 = vector.broadcast %52 : vector<1x1xf32> to vector<1x128xf32>
    %54 = arith.divf %46, %53 : vector<1x128xf32>
    %55 = arith.truncf %54 : vector<1x128xf32> to vector<1x128xbf16>
    %c0_20 = arith.constant 0 : index
    %c0_21 = arith.constant 0 : index
    %56 = vector.load %arg5[%c0_20, %c0_21] : memref<128x10xbf16, #tpu.memory_space<vmem>>, vector<128x10xbf16>
    %cst_22 = arith.constant dense<0.000000e+00> : vector<1x10xf32>
    %57 = tpu.matmul %55, %56, %cst_22 {dimension_numbers = #tpu.dot_dimension_numbers<[1], [0], [0], [1], [0, 0, 1, 1], [], []>} : vector<1x128xbf16>, vector<128x10xbf16>, vector<1x10xf32> -> vector<1x10xf32>
    %c0_23 = arith.constant 0 : index
    %c0_24 = arith.constant 0 : index
    %58 = vector.load %arg6[%c0_23, %c0_24] : memref<1x10xf32, #tpu.memory_space<vmem>>, vector<1x10xf32>
    %59 = arith.addf %57, %58 : vector<1x10xf32>
    %c0_25 = arith.constant 0 : index
    %c0_26 = arith.constant 0 : index
    %c0_27 = arith.constant 0 : index
    %60 = vector.load %arg7[%c0_25, %c0_26, %c0_27] : memref<1x1x10xf32, #tpu.memory_space<vmem>>, vector<1x1x10xf32>
    %61 = vector.shape_cast %60 : vector<1x1x10xf32> to vector<1x10xf32>
    %62 = vector.shape_cast %59 : vector<1x10xf32> to vector<1x1x10xf32>
    tpu.vector_store %arg7[%c0_25, %c0_26, %c0_27], %62 {strides = array<i32>} : memref<1x1x10xf32, #tpu.memory_space<vmem>>, vector<1x1x10xf32>,
    return
  }
  func.func @transform_0(%arg0: i32) -> (i32, i32) {
    %c0_i32 = arith.constant 0 : i32
    %c0_i32_0 = arith.constant 0 : i32
    %c0_i32_1 = arith.constant 0 : i32
    return %c0_i32, %c0_i32_0 : i32, i32
  }
  func.func @transform_1(%arg0: i32) -> (i32, i32, i32) {
    %c0_i32 = arith.constant 0 : i32
    %c0_i32_0 = arith.constant 0 : i32
    %c0_i32_1 = arith.constant 0 : i32
    return %arg0, %c0_i32, %c0_i32_0 : i32, i32, i32
  }
  func.func @transform_2(%arg0: i32) -> (i32, i32) {
    %c0_i32 = arith.constant 0 : i32
    %c0_i32_0 = arith.constant 0 : i32
    %c0_i32_1 = arith.constant 0 : i32
    return %c0_i32, %c0_i32_0 : i32, i32
  }
  func.func @transform_3(%arg0: i32) -> (i32, i32) {
    %c0_i32 = arith.constant 0 : i32
    %c0_i32_0 = arith.constant 0 : i32
    %c0_i32_1 = arith.constant 0 : i32
    return %c0_i32, %c0_i32_0 : i32, i32
  }
  func.func @transform_4(%arg0: i32) -> (i32, i32) {
    %c0_i32 = arith.constant 0 : i32
    %c0_i32_0 = arith.constant 0 : i32
    %c0_i32_1 = arith.constant 0 : i32
    return %c0_i32, %c0_i32_0 : i32, i32
  }
  func.func @transform_5(%arg0: i32) -> (i32, i32) {
    %c0_i32 = arith.constant 0 : i32
    %c0_i32_0 = arith.constant 0 : i32
    %c0_i32_1 = arith.constant 0 : i32
    return %c0_i32, %c0_i32_0 : i32, i32
  }
  func.func @transform_6(%arg0: i32) -> (i32, i32, i32) {
    %c0_i32 = arith.constant 0 : i32
    %c0_i32_0 = arith.constant 0 : i32
    %c0_i32_1 = arith.constant 0 : i32
    return %arg0, %c0_i32, %c0_i32_0 : i32, i32, i32
  }
}

</mosaic_0001>

<bundles_post_ra>
// kernel: ultron_forward.5
= control target key start
LH: loop header
LB: loop body
LE: loop exit
PB: predicated region body
PF: predicated region fallthrough
CT: control target
= control target key end

     0   :  { %s1465_s1 = inlined_call_operand.vmem [shape: bf16[384,128], index: 1, kind: input, shape index: {}]   ;;  %s1466_s0 = inlined_call_operand.vmem [shape: bf16[64,384], index: 0, kind: input, shape index: {}]   ;;  %s1467_s6 = inlined_call_operand.vmem [shape: f32[128,128], index: 6, kind: input, shape index: {}]   ;;  %s1468_s2 = inlined_call_operand.vmem [shape: f32[1,128], index: 2, kind: input, shape index: {}]   ;;  %s1469_s3 = inlined_call_operand.vmem [shape: f32[1,128], index: 3, kind: input, shape index: {}]   ;;  %s1470_s4 = inlined_call_operand.vmem [shape: f32[1,128], index: 4, kind: input, shape index: {}]   ;;  %s1471_s5 = inlined_call_operand.vmem [shape: f32[64,128], index: 5, kind: input, shape index: {}]   ;;  %s1472_s7 = inlined_call_operand.vmem [shape: bf16[64,128], index: 7, kind: output, shape index: {}]  }
   0x1   :  { %v1138_v0 = vld [vmem:[%s1465_s1 + $0x40] sm:$0xff]   ;;  %v1140_v2 = vld [vmem:[%s1465_s1 + $0x48] sm:$0xff]   ;;  %v1143_v5 = vld [vmem:[%s1465_s1 + $0x50] sm:$0xff]  }
   0x2   :  { %v1139_v1 = vld [vmem:[%s1465_s1] sm:$0xff]   ;;  %862 = vmatprep.subr.bf16.mxu0 %v1138_v0  ;;  %v1142_v4 = vld [vmem:[%s1465_s1 + $0x8] sm:$0xff]   ;;  %v1145_v7 = vld [vmem:[%s1465_s1 + $0x10] sm:$0xff]  }
   0x3   :  { %863 = vmatpush3.bf16.msra.mxu0 %v1139_v1  ;;  %v1141_v3 = vld [vmem:[%s1465_s1 + $0x80] sm:$0xff]   ;;  %v1144_v6 = vld [vmem:[%s1465_s1 + $0x88] sm:$0xff]   ;;  %v1146_v8 = vld [vmem:[%s1465_s1 + $0x58] sm:$0xff]  }
   0x4   :  { %864 = vmatprep.subr.bf16.mxu0 %v1140_v2  ;;  %962 = vmatprep.subr.bf16.mxu1 %v1141_v3  ;;  %v1147_v9 = vld [vmem:[%s1465_s1 + $0x90] sm:$0xff]   ;;  %v1148_v10 = vld [vmem:[%s1465_s1 + $0x18] sm:$0xff]   ;;  %v1149_v11 = vld [vmem:[%s1465_s1 + $0x60] sm:$0xff]  }
   0x5   :  { %963 = vmatpush3.bf16.msra.mxu1 %v1141_v3  ;;  %v1150_v12 = vld [vmem:[%s1465_s1 + $0x98] sm:$0xff]   ;;  %v1151_v13 = vld [vmem:[%s1465_s1 + $0x20] sm:$0xff]   ;;  %v1152_v15 = vld [vmem:[%s1465_s1 + $0x68] sm:$0xff]  }
   0x6   :  { %964 = vmatprep.subr.bf16.mxu1 %v1144_v6  ;;  %v1153_v14 = vld [vmem:[%s1465_s1 + $0xa0] sm:$0xff]   ;;  %v1154_v16 = vld [vmem:[%s1465_s1 + $0x28] sm:$0xff]   ;;  %v1155_v18 = vld [vmem:[%s1465_s1 + $0x70] sm:$0xff]  }
   0x7   :  { %865 = vmatpush3.bf16.msra.mxu0 %v1142_v4  ;;  %v1156_v17 = vld [vmem:[%s1465_s1 + $0xa8] sm:$0xff]   ;;  %v1157_v19 = vld [vmem:[%s1465_s1 + $0x30] sm:$0xff]   ;;  %v1158_v20 = vld [vmem:[%s1465_s1 + $0x78] sm:$0xff]  }
   0x8   :  { %866 = vmatprep.subr.bf16.mxu0 %v1143_v5  ;;  %v1159_v21 = vld [vmem:[%s1465_s1 + $0xb0] sm:$0xff]   ;;  %v1160_v23 = vld [vmem:[%s1465_s1 + $0x38] sm:$0xff]   ;;  %v1161_v26 = vld [vmem:[%s1466_s0] ss:$12 sps:$4 sm:$0xff]  }
   0x9   :  { %965 = vmatpush3.bf16.msra.mxu1 %v1144_v6  ;;  %v1163_v22 = vld [vmem:[%s1466_s0 + $0x4] ss:$12 sps:$4 sm:$0xff]   ;;  %v1165_v24 = vld [vmem:[%s1466_s0 + $0x8] ss:$12 sps:$4 sm:$0xff]   ;;  %v1164_v25 = vld [vmem:[%s1465_s1 + $0xb8] sm:$0xff]  }
   0xa   :  { %966 = vmatprep.subr.bf16.mxu1 %v1147_v9  ;;  %338 = vmatprep.mubr.bf16.mxu0 %v1163_v22  ;;  %v1167_v27 = vld [vmem:[%s1466_s0 + $0x1c] ss:$12 sps:$4 sm:$0xff]   ;;  %v1166_v28 = vld [vmem:[%s1466_s0 + $0x20] ss:$12 sps:$4 sm:$0xff]   ;;  %v1173_v31 = vld [vmem:[%s1466_s0 + $0x38] ss:$12 sps:$4 sm:$0xff]  }
   0xb   :  { %867 = vmatpush3.bf16.msra.mxu0 %v1145_v7  ;;  %978 = vmatprep.mubr.bf16.mxu1 %v1165_v24  ;;  %v436_v29 = vld [vmem:[%s1467_s6] sm:$0xff]  ;;  %v437_v30 = vld [vmem:[%s1467_s6 + $0x8] sm:$0xff]  ;;  %v438_v33 = vld [vmem:[%s1467_s6 + $0x10] sm:$0xff] }
   0xc   :  { %868 = vmatprep.subr.bf16.mxu0 %v1146_v8  ;;  %v1074_v32 = vpack.c.bf16 %v437_v30, %v436_v29  ;;  %v439_v34 = vld [vmem:[%s1467_s6 + $0x18] sm:$0xff]  ;;  %v440_v36 = vld [vmem:[%s1467_s6 + $0x20] sm:$0xff]  ;;  %v441_v37 = vld [vmem:[%s1467_s6 + $0x28] sm:$0xff] }
   0xd   :  { %967 = vmatpush3.bf16.msra.mxu1 %v1147_v9  ;;  %v1078_v35 = vpack.c.bf16 %v439_v34, %v438_v33  ;;  %v1169_v38 = vld [vmem:[%s1466_s0 + $0x18] ss:$12 sps:$4 sm:$0xff]   ;;  %v1082_v39 = vpack.c.bf16 %v441_v37, %v440_v36  ;;  %v1170_v40 = vld [vmem:[%s1466_s0 + $0x34] ss:$12 sps:$4 sm:$0xff]   ;;  %v1174_v43 = vld [vmem:[%s1466_s0 + $0x50] ss:$12 sps:$4 sm:$0xff]  }
   0xe   :  { %968 = vmatprep.subr.bf16.mxu1 %v1150_v12  ;;  %v442_v41 = vld [vmem:[%s1467_s6 + $0x30] sm:$0xff]  ;;  %v443_v42 = vld [vmem:[%s1467_s6 + $0x38] sm:$0xff]  ;;  %v444_v45 = vld [vmem:[%s1467_s6 + $0x40] sm:$0xff] }
   0xf   :  { %869 = vmatpush3.bf16.msra.mxu0 %v1148_v10  ;;  %v1086_v44 = vpack.c.bf16 %v443_v42, %v442_v41  ;;  %v445_v46 = vld [vmem:[%s1467_s6 + $0x48] sm:$0xff]  ;;  %v1172_v47 = vld [vmem:[%s1466_s0 + $0x30] ss:$12 sps:$4 sm:$0xff]   ;;  %v448_v54 = vld [vmem:[%s1467_s6 + $0x60] sm:$0xff] }
  0x10   :  { %870 = vmatprep.subr.bf16.mxu0 %v1149_v11  ;;  %v1090_v48 = vpack.c.bf16 %v445_v46, %v444_v45  ;;  %v1175_v49 = vld [vmem:[%s1466_s0 + $0x4c] ss:$12 sps:$4 sm:$0xff]   ;;  %v446_v50 = vld [vmem:[%s1467_s6 + $0x50] sm:$0xff]  ;;  %v784_v62 = vld [vmem:[%s1468_s2] ss:$0 sm:$0xff] }
  0x11   :  { %969 = vmatpush3.bf16.msra.mxu1 %v1150_v12  ;;  %v447_v51 = vld [vmem:[%s1467_s6 + $0x58] sm:$0xff]  ;;  %v1177_v53 = vld [vmem:[%s1466_s0 + $0x48] ss:$12 sps:$4 sm:$0xff]  }
  0x12   :  { %970 = vmatprep.subr.bf16.mxu1 %v1153_v14  ;;  %v1094_v52 = vpack.c.bf16 %v447_v51, %v446_v50  ;;  %v449_v55 = vld [vmem:[%s1467_s6 + $0x68] sm:$0xff]  ;;  %v450_v57 = vld [vmem:[%s1467_s6 + $0x70] sm:$0xff]  ;;  %v451_v58 = vld [vmem:[%s1467_s6 + $0x78] sm:$0xff] }
  0x13   :  { %871 = vmatpush3.bf16.msra.mxu0 %v1151_v13  ;;  %v1098_v56 = vpack.c.bf16 %v449_v55, %v448_v54  ;;  %v1102_v59 = vpack.c.bf16 %v451_v58, %v450_v57 }
  0x14   :  { %872 = vmatprep.subr.bf16.mxu0 %v1152_v15 }
  0x15   :  { %971 = vmatpush3.bf16.msra.mxu1 %v1153_v14 }
  0x16   :  { %972 = vmatprep.subr.bf16.mxu1 %v1156_v17 }
  0x17   :  { %873 = vmatpush3.bf16.msra.mxu0 %v1154_v16 }
  0x18   :  { %874 = vmatprep.subr.bf16.mxu0 %v1155_v18 }
  0x19   :  { %973 = vmatpush3.bf16.msra.mxu1 %v1156_v17 }
  0x1a   :  { %974 = vmatprep.subr.bf16.mxu1 %v1159_v21 }
  0x1b   :  { %875 = vmatpush3.bf16.msra.mxu0 %v1157_v19 }
  0x1c   :  { %876 = vmatprep.subr.bf16.mxu0 %v1158_v20 }
  0x1d   :  { %975 = vmatpush3.bf16.msra.mxu1 %v1159_v21 }
  0x1e   :  { %976 = vmatprep.subr.bf16.mxu1 %v1164_v25 }
  0x1f   :  { %877 = vmatpush3.bf16.msra.mxu0 %v1160_v23 }
  0x20   :  { %1075 = vmatprep.subr.bf16.mxu0 %v1074_v32 }
  0x21   :  { %977 = vmatpush3.bf16.msra.mxu1 %v1164_v25 }
  0x22   :  { %339 = vmatmul.mubr.bf16.vlgmr.msra.gmra.mrb[0].mxu0 %v1161_v26  ;;  %1107 = vmatprep.subr.bf16.mxu1 %v1074_v32 }
  0x23   :  { %346 = vmatprep.mubr.bf16.mxu0 %v1167_v27  ;;  %1077 = vmatpush3.bf16.msra.mxu0 %v1074_v32 }
  0x24   :  { %979 = vmatmul.mubr.bf16.vlgmr.msra.gmra.mrb[0].mxu1 %v1166_v28  ;;  %1079 = vmatprep.subr.bf16.mxu0 %v1078_v35 }
  0x25   :  { %982 = vmatprep.mubr.bf16.mxu1 %v1173_v31  ;;  %1109 = vmatpush3.bf16.msra.mxu1 %v1074_v32 }
  0x26   :  { %1111 = vmatprep.subr.bf16.mxu1 %v1078_v35 }
  0x27   :  { %1081 = vmatpush3.bf16.msra.mxu0 %v1078_v35 }
  0x28   :  { %1083 = vmatprep.subr.bf16.mxu0 %v1082_v39 }
  0x29   :  { %1113 = vmatpush3.bf16.msra.mxu1 %v1078_v35 }
  0x2a   :  { %347 = vmatmul.mubr.bf16.gmra.mrb[4].mxu0 %v1169_v38  ;;  %1115 = vmatprep.subr.bf16.mxu1 %v1082_v39 }
  0x2b   :  { %354 = vmatprep.mubr.bf16.mxu0 %v1170_v40  ;;  %1085 = vmatpush3.bf16.msra.mxu0 %v1082_v39 }
  0x2c   :  { %983 = vmatmul.mubr.bf16.gmra.mrb[4].mxu1 %v1174_v43  ;;  %1087 = vmatprep.subr.bf16.mxu0 %v1086_v44 }
  0x2d   :  { %1117 = vmatpush3.bf16.msra.mxu1 %v1082_v39 }
  0x2e   :  { %1119 = vmatprep.subr.bf16.mxu1 %v1086_v44 }
  0x2f   :  { %1089 = vmatpush3.bf16.msra.mxu0 %v1086_v44 }
  0x30   :  { %1091 = vmatprep.subr.bf16.mxu0 %v1090_v48 }
  0x31   :  { %1121 = vmatpush3.bf16.msra.mxu1 %v1086_v44 }
  0x32   :  { %355 = vmatmul.mubr.bf16.gmra.mrb[8].mxu0 %v1172_v47  ;;  %1123 = vmatprep.subr.bf16.mxu1 %v1090_v48 }
  0x33   :  { %362 = vmatprep.mubr.bf16.mxu0 %v1175_v49  ;;  %1093 = vmatpush3.bf16.msra.mxu0 %v1090_v48 }
  0x34   :  { %1095 = vmatprep.subr.bf16.mxu0 %v1094_v52 }
  0x35   :  { %1125 = vmatpush3.bf16.msra.mxu1 %v1090_v48 }
  0x36   :  { %1127 = vmatprep.subr.bf16.mxu1 %v1094_v52 }
  0x37   :  { %1097 = vmatpush3.bf16.msra.mxu0 %v1094_v52 }
  0x38   :  { %1099 = vmatprep.subr.bf16.mxu0 %v1098_v56 }
  0x39   :  { %1129 = vmatpush3.bf16.msra.mxu1 %v1094_v52 }
  0x3a   :  { %363 = vmatmul.mubr.bf16.gmra.mrb[12].mxu0 %v1177_v53  ;;  %1131 = vmatprep.subr.bf16.mxu1 %v1098_v56 }
  0x3b   :  { %1101 = vmatpush3.bf16.msra.mxu0 %v1098_v56 }
  0x3c   :  { %1103 = vmatprep.subr.bf16.mxu0 %v1102_v59 }
  0x3d   :  { %1133 = vmatpush3.bf16.msra.mxu1 %v1098_v56 }
  0x3e   :  { %1135 = vmatprep.subr.bf16.mxu1 %v1102_v59 }
  0x3f   :  { %1105 = vmatpush3.bf16.msra.mxu0 %v1102_v59 }
  0x41   :  { %1137 = vmatpush3.bf16.msra.mxu1 %v1102_v59 }
  0xf5   :  { %v878_v60 = vpop.f32.mrb[0].mxu0 }
  0xf6   :  { %v879_v61 = vpop.f32.mrb[1].mxu0 }
  0xf7   :  { %v880_v63 = vadd.f32 %v879_v61, %v878_v60  ;;  %v881_v0 = vpop.f32.mrb[2].mxu0  ;;  %v980_v2 = vpop.f32.mrb[0].mxu1 }
  0xf8   :  { %v882_v1 = vpop.f32.mrb[3].mxu0  ;;  %v405_v5 = vpop.f32.mrb[1].mxu1 }
  0xf9   :  { %v883_v3 = vadd.f32 %v882_v1, %v881_v0  ;;  %v341_v4 = vadd.f32 %v880_v63, %v784_v62  ;;  %v981_v6 = vpop.f32.mrb[2].mxu1 }
  0xfa   :  { %v408_v9 = vpop.f32.mrb[3].mxu1 }
  0xfb   :  { %v406_v7 = vadd.f32 %v405_v5, %v341_v4  ;;  %v344_v8 = vadd.f32 %v883_v3, %v784_v62 }
  0xfd   :  { %v409_v10 = vadd.f32 %v408_v9, %v344_v8  ;;  %v884_v11 = vpop.f32.mrb[4].mxu0  ;;  %1018 = vmatprep.mubr.f32.mxu0 %v406_v7 }
  0xfe   :  { %v885_v12 = vpop.f32.mrb[5].mxu0 }
  0xff   :  { %v886_v13 = vadd.f32 %v885_v12, %v884_v11  ;;  %v887_v14 = vpop.f32.mrb[6].mxu0  ;;  %1019 = vmatmul.mubr.f32.vlgmr.msra.gmra.mrb[16].mxu0 %v409_v10  ;;  %v984_v16 = vpop.f32.mrb[4].mxu1 }
 0x100   :  { %v888_v15 = vpop.f32.mrb[7].mxu0  ;;  %v421_v19 = vpop.f32.mrb[5].mxu1 }
 0x101   :  { %v349_v17 = vadd.f32 %v886_v13, %v784_v62  ;;  %v889_v18 = vadd.f32 %v888_v15, %v887_v14  ;;  %v985_v20 = vpop.f32.mrb[6].mxu1  ;;  %v1412_v14 = vld [vmem:[%s1469_s3] ss:$0 sm:$0xff] }
 0x102   :  { %v424_v23 = vpop.f32.mrb[7].mxu1 }
 0x103   :  { %v352_v21 = vadd.f32 %v889_v18, %v784_v62  ;;  %v414_v22 = vadd.f32 %v980_v2, %v349_v17  ;;  %v822_v17 = vld [vmem:[%s1470_s4] ss:$0 sm:$0xff] }
 0x105   :  { %v890_v24 = vpop.f32.mrb[8].mxu0  ;;  %1021 = vmatprep.mubr.f32.mxu0 %v414_v22  ;;  %v417_v25 = vadd.f32 %v981_v6, %v352_v21  ;;  %v725_v21 = vld [vmem:[%s1471_s5 + $0x8] sm:$0xff] }
 0x106   :  { %v891_v26 = vpop.f32.mrb[9].mxu0 }
 0x107   :  { %v892_v27 = vadd.f32 %v891_v26, %v890_v24  ;;  %v893_v28 = vpop.f32.mrb[10].mxu0  ;;  %1022 = vmatmul.mubr.f32.gmra.mrb[18].mxu0 %v417_v25  ;;  %v724_v26 = vld [vmem:[%s1471_s5] sm:$0xff] }
 0x108   :  { %v894_v29 = vpop.f32.mrb[11].mxu0 }
 0x109   :  { %v895_v30 = vadd.f32 %v894_v29, %v893_v28  ;;  %v357_v31 = vadd.f32 %v892_v27, %v784_v62 }
 0x10b   :  { %v422_v32 = vadd.f32 %v421_v19, %v357_v31  ;;  %v360_v33 = vadd.f32 %v895_v30, %v784_v62 }
 0x10d   :  { %v425_v34 = vadd.f32 %v424_v23, %v360_v33  ;;  %v896_v35 = vpop.f32.mrb[12].mxu0  ;;  %1024 = vmatprep.mubr.f32.mxu0 %v422_v32 }
 0x10e   :  { %v897_v36 = vpop.f32.mrb[13].mxu0 }
 0x10f   :  { %v898_v37 = vadd.f32 %v897_v36, %v896_v35  ;;  %v899_v38 = vpop.f32.mrb[14].mxu0  ;;  %1025 = vmatmul.mubr.f32.gmra.mrb[20].mxu0 %v425_v34 }
 0x110   :  { %v900_v39 = vpop.f32.mrb[15].mxu0 }
 0x111   :  { %v365_v40 = vadd.f32 %v898_v37, %v784_v62  ;;  %v901_v41 = vadd.f32 %v900_v39, %v899_v38  ;;  %v727_v38 = vld [vmem:[%s1471_s5 + $0x18] sm:$0xff] }
 0x113   :  { %v368_v42 = vadd.f32 %v901_v41, %v784_v62  ;;  %v430_v43 = vadd.f32 %v984_v16, %v365_v40 }
 0x115   :  { %1027 = vmatprep.mubr.f32.mxu0 %v430_v43  ;;  %v433_v44 = vadd.f32 %v985_v20, %v368_v42 }
 0x117   :  { %1028 = vmatmul.mubr.f32.gmra.mrb[22].mxu0 %v433_v44 }
 0x1d2   :  { %v1020_v45 = vpop.f32.mrb[16].mxu0 }
 0x1d3   :  { %v558_v46 = vsub.f32 %v409_v10, %v1020_v45  ;;  %v518_v47 = vpop.f32.mrb[17].mxu0 }
 0x1d4   :  { %v557_v48 = vsub.f32 %v406_v7, %v518_v47 }
 0x1d5   :  { %v566_v50 = vmul.f32 %v558_v46, %v558_v46 }
 0x1d6   :  { %v565_v49 = vmul.f32 %v557_v48, %v557_v48 }
 0x1d8   :  { %1062 = vmatprep.mubr.f32.mxu1 %v565_v49 }
 0x1d9   :  { %1063 = vmatmul.mubr.f32.vlgmr.msra.gmra.mrb[8].mxu1 %v566_v50 }
 0x1da   :  { %v1023_v51 = vpop.f32.mrb[18].mxu0 }
 0x1db   :  { %v560_v52 = vsub.f32 %v417_v25, %v1023_v51  ;;  %v528_v53 = vpop.f32.mrb[19].mxu0 }
 0x1dc   :  { %v559_v54 = vsub.f32 %v414_v22, %v528_v53 }
 0x1dd   :  { %v568_v56 = vmul.f32 %v560_v52, %v560_v52 }
 0x1de   :  { %v567_v55 = vmul.f32 %v559_v54, %v559_v54 }
 0x1e0   :  { %1065 = vmatprep.mubr.f32.mxu1 %v567_v55 }
 0x1e1   :  { %1066 = vmatmul.mubr.f32.gmra.mrb[10].mxu1 %v568_v56 }
 0x1e2   :  { %v1026_v57 = vpop.f32.mrb[20].mxu0 }
 0x1e3   :  { %v1393_v58 = vsub.f32 %v425_v34, %v1026_v57  ;;  %v538_v59 = vpop.f32.mrb[21].mxu0  ;;  %v728_v57 = vld [vmem:[%s1471_s5 + $0x20] sm:$0xff] }
 0x1e4   :  { %v1395_v60 = vsub.f32 %v422_v32, %v538_v59 }
 0x1e5   :  { %v570_v62 = vmul.f32 %v1393_v58, %v1393_v58 }
 0x1e6   :  { %v569_v61 = vmul.f32 %v1395_v60, %v1395_v60 }
 0x1e8   :  { %1068 = vmatprep.mubr.f32.mxu1 %v569_v61 }
 0x1e9   :  { %1069 = vmatmul.mubr.f32.gmra.mrb[12].mxu1 %v570_v62 }
 0x1ea   :  { %v1029_v63 = vpop.f32.mrb[22].mxu0 }
 0x1eb   :  { %v1401_v0 = vsub.f32 %v433_v44, %v1029_v63  ;;  %v548_v1 = vpop.f32.mrb[23].mxu0 }
 0x1ec   :  { %v1403_v2 = vsub.f32 %v430_v43, %v548_v1  ;;  %v726_v43 = vld [vmem:[%s1471_s5 + $0x10] sm:$0xff] }
 0x1ed   :  { %v572_v4 = vmul.f32 %v1401_v0, %v1401_v0 }
 0x1ee   :  { %v571_v3 = vmul.f32 %v1403_v2, %v1403_v2 }
 0x1f0   :  { %1071 = vmatprep.mubr.f32.mxu1 %v571_v3 }
 0x1f1   :  { %1072 = vmatmul.mubr.f32.gmra.mrb[14].mxu1 %v572_v4 }
 0x2ac   :  { %v1064_v5 = vpop.f32.mrb[8].mxu1 }
 0x2ad   :  { %v645_v6 = vadd.f32 1e-05, %v1064_v5  ;;  %v639_v7 = vpop.f32.mrb[9].mxu1  ;;  %v731_v5 = vld [vmem:[%s1471_s5 + $0x38] sm:$0xff] }
 0x2ae   :  { %v640_v8 = vadd.f32 1e-05, %v639_v7 }
 0x2af   :  { %1178 = vrsqrt.f32 %v645_v6 }
 0x2b0   :  { %1180 = vrsqrt.f32 %v640_v8 }
 0x2b4   :  { %v1067_v9 = vpop.f32.mrb[10].mxu1 }
 0x2b5   :  { %v655_v10 = vadd.f32 1e-05, %v1067_v9  ;;  %v649_v11 = vpop.f32.mrb[11].mxu1 }
 0x2b6   :  { %v650_v12 = vadd.f32 1e-05, %v649_v11 }
 0x2b7   :  { %1182 = vrsqrt.f32 %v655_v10 }
 0x2b8   :  { %1184 = vrsqrt.f32 %v650_v12 }
 0x2b9   :  { %v1179_v13 = vpop.eup %1178 }
 0x2ba   :  { %v1181_v15 = vpop.eup %1180  ;;  %v687_v16 = vmul.f32 %v1179_v13, %v558_v46 }
 0x2bb   :  { %v686_v18 = vmul.f32 %v1181_v15, %v557_v48 }
 0x2bc   :  { %v702_v19 = vmul.f32 %v1412_v14, %v687_v16  ;;  %v1070_v20 = vpop.f32.mrb[12].mxu1 }
 0x2bd   :  { %v701_v22 = vmul.f32 %v1412_v14, %v686_v18  ;;  %v665_v23 = vadd.f32 1e-05, %v1070_v20  ;;  %v659_v24 = vpop.f32.mrb[13].mxu1 }
 0x2be   :  { %v717_v25 = vadd.f32 %v822_v17, %v702_v19  ;;  %v660_v27 = vadd.f32 1e-05, %v659_v24 }
 0x2bf   :  { %v716_v28 = vadd.f32 %v822_v17, %v701_v22  ;;  %1186 = vrsqrt.f32 %v665_v23 }
 0x2c0   :  { %v733_v29 = vadd.f32 %v725_v21, %v717_v25  ;;  %1188 = vrsqrt.f32 %v660_v27 }
 0x2c1   :  { %v1183_v30 = vpop.eup %1182  ;;  %v732_v31 = vadd.f32 %v724_v26, %v716_v28 }
 0x2c2   :  { %v1185_v32 = vpop.eup %1184  ;;  %v689_v33 = vmul.f32 %v1183_v30, %v560_v52 }
 0x2c3   :  { %v842_v34 = vpack.c.bf16 %v733_v29, %v732_v31  ;;  %v688_v35 = vmul.f32 %v1185_v32, %v559_v54  ;;  %v729_v54 = vld [vmem:[%s1471_s5 + $0x28] sm:$0xff] }
 0x2c4   :  { %v704_v36 = vmul.f32 %v1412_v14, %v689_v33  ;;  %v1073_v37 = vpop.f32.mrb[14].mxu1 }
 0x2c5   :  { %843 = vst [vmem:[%s1472_s7] sm:$0xff] %v842_v34   ;;  %v703_v39 = vmul.f32 %v1412_v14, %v688_v35  ;;  %v675_v40 = vadd.f32 1e-05, %v1073_v37  ;;  %v669_v41 = vpop.f32.mrb[15].mxu1 }
 0x2c6   :  { %v719_v42 = vadd.f32 %v822_v17, %v704_v36  ;;  %v670_v44 = vadd.f32 1e-05, %v669_v41 }
 0x2c7   :  { %v718_v45 = vadd.f32 %v822_v17, %v703_v39  ;;  %1190 = vrsqrt.f32 %v675_v40 }
 0x2c8   :  { %v735_v46 = vadd.f32 %v727_v38, %v719_v42  ;;  %1192 = vrsqrt.f32 %v670_v44 }
 0x2c9   :  { %v1187_v47 = vpop.eup %1186  ;;  %v734_v48 = vadd.f32 %v726_v43, %v718_v45 }
 0x2ca   :  { %v1189_v49 = vpop.eup %1188  ;;  %v691_v50 = vmul.f32 %v1187_v47, %v1393_v58 }
 0x2cb   :  { %v847_v51 = vpack.c.bf16 %v735_v46, %v734_v48  ;;  %v690_v52 = vmul.f32 %v1189_v49, %v1395_v60 }
 0x2cc   :  { %v706_v53 = vmul.f32 %v1412_v14, %v691_v50 }
 0x2cd   :  { %859 = vst [vmem:[%s1472_s7 + $0x8] sm:$0xff] %v847_v51   ;;  %v705_v55 = vmul.f32 %v1412_v14, %v690_v52 }
 0x2ce   :  { %v721_v56 = vadd.f32 %v822_v17, %v706_v53 }
 0x2cf   :  { %v720_v58 = vadd.f32 %v822_v17, %v705_v55 }
 0x2d0   :  { %v737_v59 = vadd.f32 %v729_v54, %v721_v56 }
 0x2d1   :  { %v1191_v60 = vpop.eup %1190  ;;  %v736_v61 = vadd.f32 %v728_v57, %v720_v58 }
 0x2d2   :  { %v1193_v62 = vpop.eup %1192  ;;  %v693_v63 = vmul.f32 %v1191_v60, %v1401_v0  ;;  %v730_v0 = vld [vmem:[%s1471_s5 + $0x30] sm:$0xff] }
 0x2d3   :  { %v852_v1 = vpack.c.bf16 %v737_v59, %v736_v61  ;;  %v692_v3 = vmul.f32 %v1193_v62, %v1403_v2 }
 0x2d4   :  { %v708_v4 = vmul.f32 %v1412_v14, %v693_v63 }
 0x2d5   :  { %860 = vst [vmem:[%s1472_s7 + $0x10] sm:$0xff] %v852_v1   ;;  %v707_v6 = vmul.f32 %v1412_v14, %v692_v3 }
 0x2d6   :  { %v723_v7 = vadd.f32 %v822_v17, %v708_v4 }
 0x2d7   :  { %v722_v8 = vadd.f32 %v822_v17, %v707_v6 }
 0x2d8   :  { %v739_v9 = vadd.f32 %v731_v5, %v723_v7 }
 0x2d9   :  { %v738_v2 = vadd.f32 %v730_v0, %v722_v8 }
 0x2db   :  { %v857_v10 = vpack.c.bf16 %v739_v9, %v738_v2 }
 0x2dd   :  { %861 = vst [vmem:[%s1472_s7 + $0x18] sm:$0xff] %v857_v10  }

// kernel: ultron_forward.6
= control target key start
LH: loop header
LB: loop body
LE: loop exit
PB: predicated region body
PF: predicated region fallthrough
CT: control target
= control target key end

     0   :  { %s1133_s3 = inlined_call_operand.vmem [shape: f32[256,256], index: 3, kind: input, shape index: {}]   ;;  %s1134_s0 = inlined_call_operand.vmem [shape: bf16[32,256], index: 0, kind: input, shape index: {}]   ;;  %s1135_s4 = inlined_call_operand.vmem [shape: bf16[256,128], index: 4, kind: input, shape index: {}]   ;;  %s1136_s1 = inlined_call_operand.vmem [shape: f32[1,256], index: 1, kind: input, shape index: {}]   ;;  %s1137_s2 = inlined_call_operand.vmem [shape: f32[1,256], index: 2, kind: input, shape index: {}]   ;;  %s1138_s5 = inlined_call_operand.vmem [shape: bf16[32,128], index: 5, kind: output, shape index: {}]  }
   0x1   :  { %v34_v0 = vld [vmem:[%s1133_s3 + $0x8] sm:$0xff]  ;;  %v36_v1 = vld [vmem:[%s1133_s3 + $0x18] sm:$0xff]  ;;  %v33_v2 = vld [vmem:[%s1133_s3] sm:$0xff] }
   0x2   :  { %v615_v3 = vpack.c.bf16 %v36_v1, %v34_v0  ;;  %v35_v4 = vld [vmem:[%s1133_s3 + $0x10] sm:$0xff]  ;;  %v38_v5 = vld [vmem:[%s1133_s3 + $0x28] sm:$0xff]  ;;  %v40_v6 = vld [vmem:[%s1133_s3 + $0x38] sm:$0xff] }
   0x3   :  { %v617_v7 = vpack.c.bf16 %v35_v4, %v33_v2  ;;  %v619_v8 = vpack.c.bf16 %v40_v6, %v38_v5  ;;  %v37_v9 = vld [vmem:[%s1133_s3 + $0x20] sm:$0xff]  ;;  %v39_v10 = vld [vmem:[%s1133_s3 + $0x30] sm:$0xff]  ;;  %v42_v11 = vld [vmem:[%s1133_s3 + $0x48] sm:$0xff] }
   0x4   :  { %616 = vmatprep.subr.bf16.mxu0 %v615_v3  ;;  %v44_v12 = vld [vmem:[%s1133_s3 + $0x58] sm:$0xff]  ;;  %680 = vmatprep.subr.bf16.mxu1 %v615_v3  ;;  %v621_v13 = vpack.c.bf16 %v39_v10, %v37_v9  ;;  %v41_v15 = vld [vmem:[%s1133_s3 + $0x40] sm:$0xff]  ;;  %v43_v16 = vld [vmem:[%s1133_s3 + $0x50] sm:$0xff] }
   0x5   :  { %618 = vmatpush1.bf16.msra.mxu0 %v617_v7  ;;  %682 = vmatpush1.bf16.msra.mxu1 %v617_v7  ;;  %v623_v14 = vpack.c.bf16 %v44_v12, %v42_v11  ;;  %v46_v17 = vld [vmem:[%s1133_s3 + $0x68] sm:$0xff]  ;;  %v48_v18 = vld [vmem:[%s1133_s3 + $0x78] sm:$0xff]  ;;  %v625_v19 = vpack.c.bf16 %v43_v16, %v41_v15  ;;  %v45_v21 = vld [vmem:[%s1133_s3 + $0x60] sm:$0xff] }
   0x6   :  { %620 = vmatprep.subr.bf16.mxu0 %v619_v8  ;;  %684 = vmatprep.subr.bf16.mxu1 %v619_v8  ;;  %v627_v20 = vpack.c.bf16 %v48_v18, %v46_v17  ;;  %v47_v22 = vld [vmem:[%s1133_s3 + $0x70] sm:$0xff]  ;;  %v50_v23 = vld [vmem:[%s1133_s3 + $0x88] sm:$0xff]  ;;  %v52_v24 = vld [vmem:[%s1133_s3 + $0x98] sm:$0xff] }
   0x7   :  { %v629_v25 = vpack.c.bf16 %v47_v22, %v45_v21  ;;  %v631_v26 = vpack.c.bf16 %v52_v24, %v50_v23  ;;  %v49_v27 = vld [vmem:[%s1133_s3 + $0x80] sm:$0xff]  ;;  %v51_v28 = vld [vmem:[%s1133_s3 + $0x90] sm:$0xff]  ;;  %v54_v29 = vld [vmem:[%s1133_s3 + $0xa8] sm:$0xff] }
   0x8   :  { %v56_v30 = vld [vmem:[%s1133_s3 + $0xb8] sm:$0xff]  ;;  %v633_v31 = vpack.c.bf16 %v51_v28, %v49_v27  ;;  %v53_v33 = vld [vmem:[%s1133_s3 + $0xa0] sm:$0xff]  ;;  %v55_v34 = vld [vmem:[%s1133_s3 + $0xb0] sm:$0xff] }
   0x9   :  { %622 = vmatpush1.bf16.msra.mxu0 %v621_v13  ;;  %686 = vmatpush1.bf16.msra.mxu1 %v621_v13  ;;  %v635_v32 = vpack.c.bf16 %v56_v30, %v54_v29  ;;  %v58_v35 = vld [vmem:[%s1133_s3 + $0xc8] sm:$0xff]  ;;  %v60_v36 = vld [vmem:[%s1133_s3 + $0xd8] sm:$0xff]  ;;  %v637_v37 = vpack.c.bf16 %v55_v34, %v53_v33  ;;  %v57_v39 = vld [vmem:[%s1133_s3 + $0xc0] sm:$0xff] }
   0xa   :  { %624 = vmatprep.subr.bf16.mxu0 %v623_v14  ;;  %688 = vmatprep.subr.bf16.mxu1 %v623_v14  ;;  %v639_v38 = vpack.c.bf16 %v60_v36, %v58_v35  ;;  %v59_v40 = vld [vmem:[%s1133_s3 + $0xd0] sm:$0xff]  ;;  %v908_v41 = vld [vmem:[%s1134_s0] sm:$0xff]  ;;  %v62_v42 = vld [vmem:[%s1133_s3 + $0xe8] sm:$0xff] }
   0xb   :  { %v64_v43 = vld [vmem:[%s1133_s3 + $0xf8] sm:$0xff]  ;;  %v26_v44 = vunpack.c.h.bf16 %v908_v41  ;;  %v641_v45 = vpack.c.bf16 %v59_v40, %v57_v39  ;;  %v61_v47 = vld [vmem:[%s1133_s3 + $0xe0] sm:$0xff]  ;;  %v63_v48 = vld [vmem:[%s1133_s3 + $0xf0] sm:$0xff]  ;;  %v25_v35 = vunpack.c.l.bf16 %v908_v41 }
   0xc   :  { %v643_v46 = vpack.c.bf16 %v64_v43, %v62_v42  ;;  %v66_v49 = vld [vmem:[%s1133_s3 + $0x108] sm:$0xff]  ;;  %v68_v50 = vld [vmem:[%s1133_s3 + $0x118] sm:$0xff]  ;;  %v645_v51 = vpack.c.bf16 %v63_v48, %v61_v47  ;;  %v65_v53 = vld [vmem:[%s1133_s3 + $0x100] sm:$0xff] }
   0xd   :  { %626 = vmatpush1.bf16.msra.mxu0 %v625_v19  ;;  %690 = vmatpush1.bf16.msra.mxu1 %v625_v19  ;;  %v647_v52 = vpack.c.bf16 %v68_v50, %v66_v49  ;;  %v67_v54 = vld [vmem:[%s1133_s3 + $0x110] sm:$0xff]  ;;  %v70_v55 = vld [vmem:[%s1133_s3 + $0x128] sm:$0xff]  ;;  %v72_v56 = vld [vmem:[%s1133_s3 + $0x138] sm:$0xff] }
   0xe   :  { %628 = vmatprep.subr.bf16.mxu0 %v627_v20  ;;  %692 = vmatprep.subr.bf16.mxu1 %v627_v20  ;;  %v649_v57 = vpack.c.bf16 %v67_v54, %v65_v53  ;;  %v651_v58 = vpack.c.bf16 %v72_v56, %v70_v55  ;;  %v69_v59 = vld [vmem:[%s1133_s3 + $0x120] sm:$0xff]  ;;  %v71_v60 = vld [vmem:[%s1133_s3 + $0x130] sm:$0xff]  ;;  %v74_v61 = vld [vmem:[%s1133_s3 + $0x148] sm:$0xff] }
   0xf   :  { %161 = vmatprep.mubr.f32.mxu0 %v26_v44  ;;  %v76_v62 = vld [vmem:[%s1133_s3 + $0x158] sm:$0xff]  ;;  %v653_v63 = vpack.c.bf16 %v71_v60, %v69_v59  ;;  %v73_v1 = vld [vmem:[%s1133_s3 + $0x140] sm:$0xff]  ;;  %v75_v2 = vld [vmem:[%s1133_s3 + $0x150] sm:$0xff] }
  0x10   :  { %v655_v0 = vpack.c.bf16 %v76_v62, %v74_v61  ;;  %v78_v3 = vld [vmem:[%s1133_s3 + $0x168] sm:$0xff]  ;;  %v80_v4 = vld [vmem:[%s1133_s3 + $0x178] sm:$0xff]  ;;  %v657_v5 = vpack.c.bf16 %v75_v2, %v73_v1  ;;  %v77_v7 = vld [vmem:[%s1133_s3 + $0x160] sm:$0xff] }
  0x11   :  { %630 = vmatpush1.bf16.msra.mxu0 %v629_v25  ;;  %694 = vmatpush1.bf16.msra.mxu1 %v629_v25  ;;  %v659_v6 = vpack.c.bf16 %v80_v4, %v78_v3  ;;  %v79_v8 = vld [vmem:[%s1133_s3 + $0x170] sm:$0xff]  ;;  %v82_v9 = vld [vmem:[%s1133_s3 + $0x188] sm:$0xff]  ;;  %v84_v10 = vld [vmem:[%s1133_s3 + $0x198] sm:$0xff] }
  0x12   :  { %632 = vmatprep.subr.bf16.mxu0 %v631_v26  ;;  %696 = vmatprep.subr.bf16.mxu1 %v631_v26  ;;  %v661_v11 = vpack.c.bf16 %v79_v8, %v77_v7  ;;  %v663_v12 = vpack.c.bf16 %v84_v10, %v82_v9  ;;  %v81_v13 = vld [vmem:[%s1133_s3 + $0x180] sm:$0xff]  ;;  %v83_v14 = vld [vmem:[%s1133_s3 + $0x190] sm:$0xff]  ;;  %v86_v15 = vld [vmem:[%s1133_s3 + $0x1a8] sm:$0xff] }
  0x13   :  { %v88_v16 = vld [vmem:[%s1133_s3 + $0x1b8] sm:$0xff]  ;;  %v665_v17 = vpack.c.bf16 %v83_v14, %v81_v13  ;;  %v85_v19 = vld [vmem:[%s1133_s3 + $0x1a0] sm:$0xff]  ;;  %v87_v20 = vld [vmem:[%s1133_s3 + $0x1b0] sm:$0xff] }
  0x14   :  { %v667_v18 = vpack.c.bf16 %v88_v16, %v86_v15  ;;  %v90_v21 = vld [vmem:[%s1133_s3 + $0x1c8] sm:$0xff]  ;;  %v92_v22 = vld [vmem:[%s1133_s3 + $0x1d8] sm:$0xff]  ;;  %v669_v23 = vpack.c.bf16 %v87_v20, %v85_v19  ;;  %v89_v25 = vld [vmem:[%s1133_s3 + $0x1c0] sm:$0xff] }
  0x15   :  { %634 = vmatpush1.bf16.msra.mxu0 %v633_v31  ;;  %698 = vmatpush1.bf16.msra.mxu1 %v633_v31  ;;  %v671_v24 = vpack.c.bf16 %v92_v22, %v90_v21  ;;  %v91_v26 = vld [vmem:[%s1133_s3 + $0x1d0] sm:$0xff]  ;;  %v94_v27 = vld [vmem:[%s1133_s3 + $0x1e8] sm:$0xff]  ;;  %v96_v28 = vld [vmem:[%s1133_s3 + $0x1f8] sm:$0xff] }
  0x16   :  { %636 = vmatprep.subr.bf16.mxu0 %v635_v32  ;;  %700 = vmatprep.subr.bf16.mxu1 %v635_v32  ;;  %v673_v29 = vpack.c.bf16 %v91_v26, %v89_v25  ;;  %v675_v30 = vpack.c.bf16 %v96_v28, %v94_v27  ;;  %v93_v31 = vld [vmem:[%s1133_s3 + $0x1e0] sm:$0xff]  ;;  %v95_v32 = vld [vmem:[%s1133_s3 + $0x1f0] sm:$0xff]  ;;  %v22_v34 = vld [vmem:[%s1134_s0 + $0x8] sm:$0xff] }
  0x17   :  { %v677_v33 = vpack.c.bf16 %v95_v32, %v93_v31  ;;  %v28_v36 = vunpack.c.h.bf16 %v22_v34  ;;  %v24_v40 = vld [vmem:[%s1134_s0 + $0x18] sm:$0xff]  ;;  %v760_v47 = vld [vmem:[%s1135_s4] sm:$0xff]   ;;  %v762_v7 = vld [vmem:[%s1135_s4 + $0x8] sm:$0xff]  }
  0x18   :  { %v32_v43 = vunpack.c.h.bf16 %v24_v40  ;;  %v763_v8 = vld [vmem:[%s1135_s4 + $0x50] sm:$0xff]   ;;  %v765_v10 = vld [vmem:[%s1135_s4 + $0x58] sm:$0xff]   ;;  %v768_v13 = vld [vmem:[%s1135_s4 + $0x20] sm:$0xff]  }
  0x19   :  { %638 = vmatpush1.bf16.msra.mxu0 %v637_v37  ;;  %702 = vmatpush1.bf16.msra.mxu1 %v637_v37  ;;  %v23_v37 = vld [vmem:[%s1134_s0 + $0x10] sm:$0xff]  ;;  %v769_v14 = vld [vmem:[%s1135_s4 + $0x68] sm:$0xff]   ;;  %v774_v19 = vld [vmem:[%s1135_s4 + $0x38] sm:$0xff]  }
  0x1a   :  { %640 = vmatprep.subr.bf16.mxu0 %v639_v38  ;;  %704 = vmatprep.subr.bf16.mxu1 %v639_v38  ;;  %v27_v38 = vunpack.c.l.bf16 %v22_v34  ;;  %v30_v39 = vunpack.c.h.bf16 %v23_v37  ;;  %v29_v42 = vunpack.c.l.bf16 %v23_v37  ;;  %v764_v9 = vld [vmem:[%s1135_s4 + $0x10] sm:$0xff]   ;;  %v770_v15 = vld [vmem:[%s1135_s4 + $0x28] sm:$0xff]  }
  0x1b   :  { %v771_v16 = vld [vmem:[%s1135_s4 + $0x70] sm:$0xff]  }
  0x1d   :  { %642 = vmatpush1.bf16.msra.mxu0 %v641_v45  ;;  %706 = vmatpush1.bf16.msra.mxu1 %v641_v45  ;;  %v31_v45 = vunpack.c.l.bf16 %v24_v40 }
  0x1e   :  { %644 = vmatprep.subr.bf16.mxu0 %v643_v46  ;;  %708 = vmatprep.subr.bf16.mxu1 %v643_v46  ;;  %v759_v46 = vld [vmem:[%s1135_s4 + $0x40] sm:$0xff]  }
  0x21   :  { %646 = vmatpush1.bf16.msra.mxu0 %v645_v51  ;;  %710 = vmatpush1.bf16.msra.mxu1 %v645_v51 }
  0x22   :  { %648 = vmatprep.subr.bf16.mxu0 %v647_v52  ;;  %712 = vmatprep.subr.bf16.mxu1 %v647_v52 }
  0x25   :  { %650 = vmatpush1.bf16.msra.mxu0 %v649_v57  ;;  %714 = vmatpush1.bf16.msra.mxu1 %v649_v57 }
  0x26   :  { %652 = vmatprep.subr.bf16.mxu0 %v651_v58  ;;  %716 = vmatprep.subr.bf16.mxu1 %v651_v58 }
  0x29   :  { %654 = vmatpush1.bf16.msra.mxu0 %v653_v63  ;;  %718 = vmatpush1.bf16.msra.mxu1 %v653_v63 }
  0x2a   :  { %656 = vmatprep.subr.bf16.mxu0 %v655_v0  ;;  %720 = vmatprep.subr.bf16.mxu1 %v655_v0 }
  0x2d   :  { %658 = vmatpush1.bf16.msra.mxu0 %v657_v5  ;;  %722 = vmatpush1.bf16.msra.mxu1 %v657_v5 }
  0x2e   :  { %660 = vmatprep.subr.bf16.mxu0 %v659_v6  ;;  %724 = vmatprep.subr.bf16.mxu1 %v659_v6  ;;  %v761_v6 = vld [vmem:[%s1135_s4 + $0x48] sm:$0xff]  }
  0x31   :  { %662 = vmatpush1.bf16.msra.mxu0 %v661_v11  ;;  %726 = vmatpush1.bf16.msra.mxu1 %v661_v11  ;;  %v766_v11 = vld [vmem:[%s1135_s4 + $0x18] sm:$0xff]  }
  0x32   :  { %664 = vmatprep.subr.bf16.mxu0 %v663_v12  ;;  %728 = vmatprep.subr.bf16.mxu1 %v663_v12  ;;  %v767_v12 = vld [vmem:[%s1135_s4 + $0x60] sm:$0xff]  }
  0x35   :  { %666 = vmatpush1.bf16.msra.mxu0 %v665_v17  ;;  %730 = vmatpush1.bf16.msra.mxu1 %v665_v17  ;;  %v772_v17 = vld [vmem:[%s1135_s4 + $0x30] sm:$0xff]  }
  0x36   :  { %668 = vmatprep.subr.bf16.mxu0 %v667_v18  ;;  %732 = vmatprep.subr.bf16.mxu1 %v667_v18  ;;  %v773_v18 = vld [vmem:[%s1135_s4 + $0x78] sm:$0xff]  }
  0x39   :  { %670 = vmatpush1.bf16.msra.mxu0 %v669_v23  ;;  %734 = vmatpush1.bf16.msra.mxu1 %v669_v23  ;;  %v309_v23 = vlaneseq }
  0x3a   :  { %672 = vmatprep.subr.bf16.mxu0 %v671_v24  ;;  %736 = vmatprep.subr.bf16.mxu1 %v671_v24 }
  0x3b   :  { %v310_v28 = vshrl.u32 %v309_v23, 7 }
  0x3d   :  { %674 = vmatpush1.bf16.msra.mxu0 %v673_v29  ;;  %738 = vmatpush1.bf16.msra.mxu1 %v673_v29 }
  0x3e   :  { %676 = vmatprep.subr.bf16.mxu0 %v675_v30  ;;  %740 = vmatprep.subr.bf16.mxu1 %v675_v30 }
  0x41   :  { %678 = vmatpush1.bf16.msra.mxu0 %v677_v33  ;;  %742 = vmatpush1.bf16.msra.mxu1 %v677_v33  ;;  %v311_v33 = vsub.s32 0, %v310_v28 }
  0x42   :  { %587 = vmatprep.subr.bf16.mxu0 %v759_v46  ;;  %743 = vmatprep.subr.bf16.mxu1 %v759_v46 }
  0x44   :  { %162 = vmatmul.mubr.f32.vlgmr.msra.gmra.mrb[0].mxu0 %v25_v35 }
  0x45   :  { %167 = vmatprep.mubr.f32.mxu0 %v28_v36  ;;  %588 = vmatpush3.bf16.msra.mxu0 %v760_v47 }
  0x46   :  { %589 = vmatprep.subr.bf16.mxu0 %v761_v6 }
  0x48   :  { %168 = vmatmul.mubr.f32.gmra.mrb[2].mxu0 %v27_v38 }
  0x49   :  { %173 = vmatprep.mubr.f32.mxu0 %v30_v39  ;;  %590 = vmatpush3.bf16.msra.mxu0 %v762_v7 }
  0x4a   :  { %591 = vmatprep.subr.bf16.mxu0 %v763_v8 }
  0x4c   :  { %174 = vmatmul.mubr.f32.gmra.mrb[4].mxu0 %v29_v42 }
  0x4d   :  { %179 = vmatprep.mubr.f32.mxu0 %v32_v43  ;;  %592 = vmatpush3.bf16.msra.mxu0 %v764_v9 }
  0x4e   :  { %593 = vmatprep.subr.bf16.mxu0 %v765_v10 }
  0x50   :  { %180 = vmatmul.mubr.f32.gmra.mrb[6].mxu0 %v31_v45 }
  0x51   :  { %594 = vmatpush3.bf16.msra.mxu0 %v766_v11 }
  0x52   :  { %595 = vmatprep.subr.bf16.mxu0 %v767_v12 }
  0x55   :  { %596 = vmatpush3.bf16.msra.mxu0 %v768_v13 }
  0x56   :  { %597 = vmatprep.subr.bf16.mxu0 %v769_v14 }
  0x59   :  { %598 = vmatpush3.bf16.msra.mxu0 %v770_v15 }
  0x5a   :  { %599 = vmatprep.subr.bf16.mxu0 %v771_v16 }
  0x5d   :  { %600 = vmatpush3.bf16.msra.mxu0 %v772_v17 }
  0x5e   :  { %601 = vmatprep.subr.bf16.mxu0 %v773_v18 }
  0x61   :  { %602 = vmatpush3.bf16.msra.mxu0 %v774_v19 }
 0x117   :  { %v163_v48 = vpop.f32.mrb[0].mxu0 }
 0x118   :  { %v1037_v49 = vsub.f32 %v25_v35, %v163_v48  ;;  %v165_v50 = vpop.f32.mrb[1].mxu0  ;;  %v307_v35 = vld [vmem:[%s1136_s1] sm:$0x3] }
 0x119   :  { %v1041_v51 = vsub.f32 %v26_v44, %v165_v50  ;;  %v327_v50 = vld [vmem:[%s1137_s2] sm:$0x3] }
 0x11a   :  { %v194_v54 = vmul.f32 %v1037_v49, %v1037_v49 }
 0x11b   :  { %v169_v52 = vpop.f32.mrb[2].mxu0  ;;  %v195_v53 = vmul.f32 %v1041_v51, %v1041_v51 }
 0x11c   :  { %v1047_v55 = vsub.f32 %v27_v38, %v169_v52  ;;  %v171_v56 = vpop.f32.mrb[3].mxu0 }
 0x11d   :  { %v1049_v57 = vsub.f32 %v28_v36, %v171_v56  ;;  %266 = vmatprep.mubr.f32.mxu1 %v195_v53  ;;  %v315_v36 = vsub.s32 1, %v310_v28 }
 0x11e   :  { %267 = vmatmul.mubr.f32.vlgmr.msra.gmra.mrb[0].mxu1 %v194_v54  ;;  %v196_v44 = vmul.f32 %v1047_v55, %v1047_v55 }
 0x11f   :  { %v197_v58 = vmul.f32 %v1049_v57, %v1049_v57  ;;  %v175_v41 = vpop.f32.mrb[4].mxu0  ;;  %751 = vmatpush3.bf16.msra.mxu1 %v760_v47  ;;  %v316_v48 = vrot.slane %v307_v35, %v315_v36 }
 0x120   :  { %v1055_v59 = vsub.f32 %v29_v42, %v175_v41  ;;  %v177_v60 = vpop.f32.mrb[5].mxu0  ;;  %744 = vmatprep.subr.bf16.mxu1 %v761_v6 }
 0x121   :  { %v1057_v61 = vsub.f32 %v30_v39, %v177_v60  ;;  %272 = vmatprep.mubr.f32.mxu1 %v197_v58  ;;  %v332_v58 = vrot.slane %v327_v50, %v311_v33 }
 0x122   :  { %273 = vmatmul.mubr.f32.gmra.mrb[2].mxu1 %v196_v44  ;;  %v198_v0 = vmul.f32 %v1055_v59, %v1055_v59  ;;  %v336_v44 = vrot.slane %v327_v50, %v315_v36 }
 0x123   :  { %v199_v62 = vmul.f32 %v1057_v61, %v1057_v61  ;;  %v181_v63 = vpop.f32.mrb[6].mxu0  ;;  %752 = vmatpush3.bf16.msra.mxu1 %v762_v7 }
 0x124   :  { %v1063_v1 = vsub.f32 %v31_v45, %v181_v63  ;;  %v183_v2 = vpop.f32.mrb[7].mxu0  ;;  %745 = vmatprep.subr.bf16.mxu1 %v763_v8  ;;  %v312_v45 = vrot.slane %v307_v35, %v311_v33 }
 0x125   :  { %v1065_v3 = vsub.f32 %v32_v43, %v183_v2  ;;  %278 = vmatprep.mubr.f32.mxu1 %v199_v62 }
 0x126   :  { %279 = vmatmul.mubr.f32.gmra.mrb[4].mxu1 %v198_v0  ;;  %v200_v5 = vmul.f32 %v1063_v1, %v1063_v1 }
 0x127   :  { %v201_v4 = vmul.f32 %v1065_v3, %v1065_v3  ;;  %753 = vmatpush3.bf16.msra.mxu1 %v764_v9 }
 0x128   :  { %746 = vmatprep.subr.bf16.mxu1 %v765_v10 }
 0x129   :  { %284 = vmatprep.mubr.f32.mxu1 %v201_v4 }
 0x12a   :  { %285 = vmatmul.mubr.f32.gmra.mrb[6].mxu1 %v200_v5 }
 0x12b   :  { %754 = vmatpush3.bf16.msra.mxu1 %v766_v11 }
 0x12c   :  { %747 = vmatprep.subr.bf16.mxu1 %v767_v12 }
 0x12f   :  { %755 = vmatpush3.bf16.msra.mxu1 %v768_v13 }
 0x130   :  { %748 = vmatprep.subr.bf16.mxu1 %v769_v14 }
 0x133   :  { %756 = vmatpush3.bf16.msra.mxu1 %v770_v15 }
 0x134   :  { %749 = vmatprep.subr.bf16.mxu1 %v771_v16 }
 0x137   :  { %757 = vmatpush3.bf16.msra.mxu1 %v772_v17 }
 0x138   :  { %750 = vmatprep.subr.bf16.mxu1 %v773_v18 }
 0x13b   :  { %758 = vmatpush3.bf16.msra.mxu1 %v774_v19 }
 0x1f1   :  { %v268_v20 = vpop.f32.mrb[0].mxu1 }
 0x1f2   :  { %v269_v21 = vadd.f32 1e-05, %v268_v20  ;;  %v270_v22 = vpop.f32.mrb[1].mxu1 }
 0x1f3   :  { %v271_v24 = vadd.f32 1e-05, %v270_v22 }
 0x1f4   :  { %775 = vrsqrt.f32 %v269_v21 }
 0x1f5   :  { %777 = vrsqrt.f32 %v271_v24  ;;  %v274_v25 = vpop.f32.mrb[2].mxu1 }
 0x1f6   :  { %v275_v26 = vadd.f32 1e-05, %v274_v25  ;;  %v276_v27 = vpop.f32.mrb[3].mxu1 }
 0x1f7   :  { %v277_v29 = vadd.f32 1e-05, %v276_v27 }
 0x1f8   :  { %779 = vrsqrt.f32 %v275_v26 }
 0x1f9   :  { %781 = vrsqrt.f32 %v277_v29  ;;  %v280_v30 = vpop.f32.mrb[4].mxu1 }
 0x1fa   :  { %v281_v31 = vadd.f32 1e-05, %v280_v30  ;;  %v282_v32 = vpop.f32.mrb[5].mxu1 }
 0x1fb   :  { %v283_v34 = vadd.f32 1e-05, %v282_v32 }
 0x1fc   :  { %783 = vrsqrt.f32 %v281_v31 }
 0x1fd   :  { %785 = vrsqrt.f32 %v283_v34  ;;  %v286_v37 = vpop.f32.mrb[6].mxu1 }
 0x1fe   :  { %v776_v38 = vpop.eup %775  ;;  %v287_v39 = vadd.f32 1e-05, %v286_v37  ;;  %v288_v40 = vpop.f32.mrb[7].mxu1 }
 0x1ff   :  { %v778_v42 = vpop.eup %777  ;;  %v299_v43 = vmul.f32 %v776_v38, %v1037_v49  ;;  %v289_v46 = vadd.f32 1e-05, %v288_v40 }
 0x200   :  { %787 = vrsqrt.f32 %v287_v39  ;;  %v300_v47 = vmul.f32 %v778_v42, %v1041_v51 }
 0x201   :  { %789 = vrsqrt.f32 %v289_v46  ;;  %v319_v54 = vmul.f32 %v312_v45, %v299_v43 }
 0x202   :  { %v780_v52 = vpop.eup %779  ;;  %v320_v49 = vmul.f32 %v316_v48, %v300_v47 }
 0x203   :  { %v782_v53 = vpop.eup %781  ;;  %v301_v56 = vmul.f32 %v780_v52, %v1047_v55  ;;  %v339_v2 = vadd.f32 %v332_v58, %v319_v54 }
 0x204   :  { %v302_v41 = vmul.f32 %v782_v53, %v1049_v57  ;;  %v340_v5 = vadd.f32 %v336_v44, %v320_v49 }
 0x205   :  { %v321_v60 = vmul.f32 %v312_v45, %v301_v56 }
 0x206   :  { %v784_v62 = vpop.eup %783  ;;  %v322_v63 = vmul.f32 %v316_v48, %v302_v41 }
 0x207   :  { %v786_v51 = vpop.eup %785  ;;  %v303_v0 = vmul.f32 %v784_v62, %v1055_v59  ;;  %v341_v4 = vadd.f32 %v332_v58, %v321_v60 }
 0x208   :  { %v342_v6 = vadd.f32 %v336_v44, %v322_v63  ;;  %v304_v7 = vmul.f32 %v786_v51, %v1057_v61 }
 0x209   :  { %v347_v8 = vpack.c.bf16 %v341_v4, %v339_v2  ;;  %v323_v11 = vmul.f32 %v312_v45, %v303_v0 }
 0x20a   :  { %v788_v9 = vpop.eup %787  ;;  %v348_v55 = vpack.c.bf16 %v342_v6, %v340_v5  ;;  %v324_v13 = vmul.f32 %v316_v48, %v304_v7 }
 0x20b   :  { %v790_v10 = vpop.eup %789  ;;  %v305_v57 = vmul.f32 %v788_v9, %v1063_v1  ;;  %v343_v15 = vadd.f32 %v332_v58, %v323_v11 }
 0x20c   :  { %511 = vmatprep.mubr.bf16.mxu0 %v348_v55  ;;  %v306_v12 = vmul.f32 %v790_v10, %v1065_v3  ;;  %v344_v17 = vadd.f32 %v336_v44, %v324_v13 }
 0x20d   :  { %v325_v14 = vmul.f32 %v312_v45, %v305_v57  ;;  %512 = vmatmul.mubr.bf16.vlgmr.msra.gmra.mrb[8].mxu0 %v347_v8 }
 0x20e   :  { %v326_v59 = vmul.f32 %v316_v48, %v306_v12 }
 0x20f   :  { %v345_v16 = vadd.f32 %v332_v58, %v325_v14 }
 0x210   :  { %v346_v18 = vadd.f32 %v336_v44, %v326_v59 }
 0x211   :  { %v349_v19 = vpack.c.bf16 %v345_v16, %v343_v15 }
 0x212   :  { %v350_v61 = vpack.c.bf16 %v346_v18, %v344_v17 }
 0x214   :  { %519 = vmatprep.mubr.bf16.mxu1 %v350_v61 }
 0x215   :  { %520 = vmatmul.mubr.bf16.vlgmr.msra.gmra.mrb[8].mxu1 %v349_v19 }
 0x2e0   :  { %v603_v20 = vpop.f32.mrb[8].mxu0 }
 0x2e1   :  { %v604_v21 = vpop.f32.mrb[9].mxu0 }
 0x2e2   :  { %v605_v22 = vadd.f32 %v604_v21, %v603_v20  ;;  %v606_v23 = vpop.f32.mrb[10].mxu0 }
 0x2e3   :  { %v607_v1 = vpop.f32.mrb[11].mxu0 }
 0x2e4   :  { %v608_v24 = vadd.f32 %v607_v1, %v606_v23 }
 0x2e6   :  { %v579_v25 = vpack.c.bf16 %v608_v24, %v605_v22 }
 0x2e8   :  { %580 = vst [vmem:[%s1138_s5] sm:$0xff] %v579_v25   ;;  %v609_v3 = vpop.f32.mrb[8].mxu1 }
 0x2e9   :  { %v610_v26 = vpop.f32.mrb[9].mxu1 }
 0x2ea   :  { %v611_v27 = vadd.f32 %v610_v26, %v609_v3  ;;  %v612_v28 = vpop.f32.mrb[10].mxu1 }
 0x2eb   :  { %v613_v29 = vpop.f32.mrb[11].mxu1 }
 0x2ec   :  { %v614_v30 = vadd.f32 %v613_v29, %v612_v28 }
 0x2ee   :  { %v584_v31 = vpack.c.bf16 %v614_v30, %v611_v27 }
 0x2f0   :  { %586 = vst [vmem:[%s1138_s5 + $0x8] sm:$0xff] %v584_v31  }

// kernel: ultron_forward.7
= control target key start
LH: loop header
LB: loop body
LE: loop exit
PB: predicated region body
PF: predicated region fallthrough
CT: control target
= control target key end

     0   :  { %s990_s3 = inlined_call_operand.vmem [shape: f32[256,256], index: 3, kind: input, shape index: {}]   ;;  %s991_s0 = inlined_call_operand.vmem [shape: bf16[16,256], index: 0, kind: input, shape index: {}]   ;;  %s992_s4 = inlined_call_operand.vmem [shape: bf16[256,128], index: 4, kind: input, shape index: {}]   ;;  %s993_s1 = inlined_call_operand.vmem [shape: f32[1,256], index: 1, kind: input, shape index: {}]   ;;  %s994_s2 = inlined_call_operand.vmem [shape: f32[1,256], index: 2, kind: input, shape index: {}]   ;;  %s995_s5 = inlined_call_operand.vmem [shape: bf16[16,128], index: 5, kind: output, shape index: {}]  }
   0x1   :  { %v28_v0 = vld [vmem:[%s990_s3 + $0x8] sm:$0xff]  ;;  %v30_v1 = vld [vmem:[%s990_s3 + $0x18] sm:$0xff]  ;;  %v27_v2 = vld [vmem:[%s990_s3] sm:$0xff] }
   0x2   :  { %v525_v3 = vpack.c.bf16 %v30_v1, %v28_v0  ;;  %v29_v4 = vld [vmem:[%s990_s3 + $0x10] sm:$0xff]  ;;  %v32_v5 = vld [vmem:[%s990_s3 + $0x28] sm:$0xff]  ;;  %v34_v6 = vld [vmem:[%s990_s3 + $0x38] sm:$0xff] }
   0x3   :  { %v527_v7 = vpack.c.bf16 %v29_v4, %v27_v2  ;;  %v529_v8 = vpack.c.bf16 %v34_v6, %v32_v5  ;;  %v31_v9 = vld [vmem:[%s990_s3 + $0x20] sm:$0xff]  ;;  %v33_v10 = vld [vmem:[%s990_s3 + $0x30] sm:$0xff]  ;;  %v36_v11 = vld [vmem:[%s990_s3 + $0x48] sm:$0xff] }
   0x4   :  { %526 = vmatprep.subr.bf16.mxu0 %v525_v3  ;;  %v38_v12 = vld [vmem:[%s990_s3 + $0x58] sm:$0xff]  ;;  %590 = vmatprep.subr.bf16.mxu1 %v525_v3  ;;  %v531_v13 = vpack.c.bf16 %v33_v10, %v31_v9  ;;  %v35_v15 = vld [vmem:[%s990_s3 + $0x40] sm:$0xff]  ;;  %v37_v16 = vld [vmem:[%s990_s3 + $0x50] sm:$0xff] }
   0x5   :  { %528 = vmatpush1.bf16.msra.mxu0 %v527_v7  ;;  %592 = vmatpush1.bf16.msra.mxu1 %v527_v7  ;;  %v533_v14 = vpack.c.bf16 %v38_v12, %v36_v11  ;;  %v40_v17 = vld [vmem:[%s990_s3 + $0x68] sm:$0xff]  ;;  %v42_v18 = vld [vmem:[%s990_s3 + $0x78] sm:$0xff]  ;;  %v535_v19 = vpack.c.bf16 %v37_v16, %v35_v15  ;;  %v39_v21 = vld [vmem:[%s990_s3 + $0x60] sm:$0xff] }
   0x6   :  { %530 = vmatprep.subr.bf16.mxu0 %v529_v8  ;;  %594 = vmatprep.subr.bf16.mxu1 %v529_v8  ;;  %v537_v20 = vpack.c.bf16 %v42_v18, %v40_v17  ;;  %v41_v22 = vld [vmem:[%s990_s3 + $0x70] sm:$0xff]  ;;  %v44_v23 = vld [vmem:[%s990_s3 + $0x88] sm:$0xff]  ;;  %v46_v24 = vld [vmem:[%s990_s3 + $0x98] sm:$0xff] }
   0x7   :  { %v539_v25 = vpack.c.bf16 %v41_v22, %v39_v21  ;;  %v541_v26 = vpack.c.bf16 %v46_v24, %v44_v23  ;;  %v43_v27 = vld [vmem:[%s990_s3 + $0x80] sm:$0xff]  ;;  %v45_v28 = vld [vmem:[%s990_s3 + $0x90] sm:$0xff]  ;;  %v48_v29 = vld [vmem:[%s990_s3 + $0xa8] sm:$0xff] }
   0x8   :  { %v50_v30 = vld [vmem:[%s990_s3 + $0xb8] sm:$0xff]  ;;  %v543_v31 = vpack.c.bf16 %v45_v28, %v43_v27  ;;  %v47_v33 = vld [vmem:[%s990_s3 + $0xa0] sm:$0xff]  ;;  %v49_v34 = vld [vmem:[%s990_s3 + $0xb0] sm:$0xff] }
   0x9   :  { %532 = vmatpush1.bf16.msra.mxu0 %v531_v13  ;;  %596 = vmatpush1.bf16.msra.mxu1 %v531_v13  ;;  %v545_v32 = vpack.c.bf16 %v50_v30, %v48_v29  ;;  %v52_v35 = vld [vmem:[%s990_s3 + $0xc8] sm:$0xff]  ;;  %v54_v36 = vld [vmem:[%s990_s3 + $0xd8] sm:$0xff]  ;;  %v547_v37 = vpack.c.bf16 %v49_v34, %v47_v33  ;;  %v51_v39 = vld [vmem:[%s990_s3 + $0xc0] sm:$0xff] }
   0xa   :  { %534 = vmatprep.subr.bf16.mxu0 %v533_v14  ;;  %598 = vmatprep.subr.bf16.mxu1 %v533_v14  ;;  %v549_v38 = vpack.c.bf16 %v54_v36, %v52_v35  ;;  %v53_v40 = vld [vmem:[%s990_s3 + $0xd0] sm:$0xff]  ;;  %v794_v41 = vld [vmem:[%s991_s0] sm:$0xff]  ;;  %v56_v42 = vld [vmem:[%s990_s3 + $0xe8] sm:$0xff] }
   0xb   :  { %v58_v43 = vld [vmem:[%s990_s3 + $0xf8] sm:$0xff]  ;;  %v24_v44 = vunpack.c.h.bf16 %v794_v41  ;;  %v551_v45 = vpack.c.bf16 %v53_v40, %v51_v39  ;;  %v55_v47 = vld [vmem:[%s990_s3 + $0xe0] sm:$0xff]  ;;  %v57_v48 = vld [vmem:[%s990_s3 + $0xf0] sm:$0xff]  ;;  %v23_v35 = vunpack.c.l.bf16 %v794_v41 }
   0xc   :  { %v553_v46 = vpack.c.bf16 %v58_v43, %v56_v42  ;;  %v60_v49 = vld [vmem:[%s990_s3 + $0x108] sm:$0xff]  ;;  %v62_v50 = vld [vmem:[%s990_s3 + $0x118] sm:$0xff]  ;;  %v555_v51 = vpack.c.bf16 %v57_v48, %v55_v47  ;;  %v59_v53 = vld [vmem:[%s990_s3 + $0x100] sm:$0xff] }
   0xd   :  { %536 = vmatpush1.bf16.msra.mxu0 %v535_v19  ;;  %600 = vmatpush1.bf16.msra.mxu1 %v535_v19  ;;  %v557_v52 = vpack.c.bf16 %v62_v50, %v60_v49  ;;  %v61_v54 = vld [vmem:[%s990_s3 + $0x110] sm:$0xff]  ;;  %v64_v55 = vld [vmem:[%s990_s3 + $0x128] sm:$0xff]  ;;  %v66_v56 = vld [vmem:[%s990_s3 + $0x138] sm:$0xff] }
   0xe   :  { %538 = vmatprep.subr.bf16.mxu0 %v537_v20  ;;  %602 = vmatprep.subr.bf16.mxu1 %v537_v20  ;;  %v559_v57 = vpack.c.bf16 %v61_v54, %v59_v53  ;;  %v561_v58 = vpack.c.bf16 %v66_v56, %v64_v55  ;;  %v63_v59 = vld [vmem:[%s990_s3 + $0x120] sm:$0xff]  ;;  %v65_v60 = vld [vmem:[%s990_s3 + $0x130] sm:$0xff]  ;;  %v68_v61 = vld [vmem:[%s990_s3 + $0x148] sm:$0xff] }
   0xf   :  { %155 = vmatprep.mubr.f32.mxu0 %v24_v44  ;;  %v70_v62 = vld [vmem:[%s990_s3 + $0x158] sm:$0xff]  ;;  %v563_v63 = vpack.c.bf16 %v65_v60, %v63_v59  ;;  %v67_v1 = vld [vmem:[%s990_s3 + $0x140] sm:$0xff]  ;;  %v69_v2 = vld [vmem:[%s990_s3 + $0x150] sm:$0xff] }
  0x10   :  { %v565_v0 = vpack.c.bf16 %v70_v62, %v68_v61  ;;  %v72_v3 = vld [vmem:[%s990_s3 + $0x168] sm:$0xff]  ;;  %v74_v4 = vld [vmem:[%s990_s3 + $0x178] sm:$0xff]  ;;  %v567_v5 = vpack.c.bf16 %v69_v2, %v67_v1  ;;  %v71_v7 = vld [vmem:[%s990_s3 + $0x160] sm:$0xff] }
  0x11   :  { %540 = vmatpush1.bf16.msra.mxu0 %v539_v25  ;;  %604 = vmatpush1.bf16.msra.mxu1 %v539_v25  ;;  %v569_v6 = vpack.c.bf16 %v74_v4, %v72_v3  ;;  %v73_v8 = vld [vmem:[%s990_s3 + $0x170] sm:$0xff]  ;;  %v76_v9 = vld [vmem:[%s990_s3 + $0x188] sm:$0xff]  ;;  %v78_v10 = vld [vmem:[%s990_s3 + $0x198] sm:$0xff] }
  0x12   :  { %542 = vmatprep.subr.bf16.mxu0 %v541_v26  ;;  %606 = vmatprep.subr.bf16.mxu1 %v541_v26  ;;  %v571_v11 = vpack.c.bf16 %v73_v8, %v71_v7  ;;  %v573_v12 = vpack.c.bf16 %v78_v10, %v76_v9  ;;  %v75_v13 = vld [vmem:[%s990_s3 + $0x180] sm:$0xff]  ;;  %v77_v14 = vld [vmem:[%s990_s3 + $0x190] sm:$0xff]  ;;  %v80_v15 = vld [vmem:[%s990_s3 + $0x1a8] sm:$0xff] }
  0x13   :  { %v82_v16 = vld [vmem:[%s990_s3 + $0x1b8] sm:$0xff]  ;;  %v575_v17 = vpack.c.bf16 %v77_v14, %v75_v13  ;;  %v79_v19 = vld [vmem:[%s990_s3 + $0x1a0] sm:$0xff]  ;;  %v81_v20 = vld [vmem:[%s990_s3 + $0x1b0] sm:$0xff] }
  0x14   :  { %v577_v18 = vpack.c.bf16 %v82_v16, %v80_v15  ;;  %v84_v21 = vld [vmem:[%s990_s3 + $0x1c8] sm:$0xff]  ;;  %v86_v22 = vld [vmem:[%s990_s3 + $0x1d8] sm:$0xff]  ;;  %v579_v23 = vpack.c.bf16 %v81_v20, %v79_v19  ;;  %v83_v25 = vld [vmem:[%s990_s3 + $0x1c0] sm:$0xff] }
  0x15   :  { %544 = vmatpush1.bf16.msra.mxu0 %v543_v31  ;;  %608 = vmatpush1.bf16.msra.mxu1 %v543_v31  ;;  %v581_v24 = vpack.c.bf16 %v86_v22, %v84_v21  ;;  %v85_v26 = vld [vmem:[%s990_s3 + $0x1d0] sm:$0xff]  ;;  %v88_v27 = vld [vmem:[%s990_s3 + $0x1e8] sm:$0xff]  ;;  %v90_v28 = vld [vmem:[%s990_s3 + $0x1f8] sm:$0xff] }
  0x16   :  { %546 = vmatprep.subr.bf16.mxu0 %v545_v32  ;;  %610 = vmatprep.subr.bf16.mxu1 %v545_v32  ;;  %v583_v29 = vpack.c.bf16 %v85_v26, %v83_v25  ;;  %v585_v30 = vpack.c.bf16 %v90_v28, %v88_v27  ;;  %v87_v31 = vld [vmem:[%s990_s3 + $0x1e0] sm:$0xff]  ;;  %v89_v32 = vld [vmem:[%s990_s3 + $0x1f0] sm:$0xff]  ;;  %v22_v34 = vld [vmem:[%s991_s0 + $0x8] sm:$0xff] }
  0x17   :  { %v587_v33 = vpack.c.bf16 %v89_v32, %v87_v31  ;;  %v26_v36 = vunpack.c.h.bf16 %v22_v34  ;;  %v654_v39 = vld [vmem:[%s992_s4] sm:$0xff]   ;;  %v656_v53 = vld [vmem:[%s992_s4 + $0x8] sm:$0xff]   ;;  %v657_v54 = vld [vmem:[%s992_s4 + $0x50] sm:$0xff]  }
  0x18   :  { %v658_v55 = vld [vmem:[%s992_s4 + $0x10] sm:$0xff]   ;;  %v659_v56 = vld [vmem:[%s992_s4 + $0x58] sm:$0xff]   ;;  %v662_v59 = vld [vmem:[%s992_s4 + $0x20] sm:$0xff]  }
  0x19   :  { %548 = vmatpush1.bf16.msra.mxu0 %v547_v37  ;;  %612 = vmatpush1.bf16.msra.mxu1 %v547_v37  ;;  %v25_v37 = vunpack.c.l.bf16 %v22_v34  ;;  %v663_v60 = vld [vmem:[%s992_s4 + $0x68] sm:$0xff]   ;;  %v665_v62 = vld [vmem:[%s992_s4 + $0x70] sm:$0xff]   ;;  %v668_v1 = vld [vmem:[%s992_s4 + $0x38] sm:$0xff]  }
  0x1a   :  { %550 = vmatprep.subr.bf16.mxu0 %v549_v38  ;;  %614 = vmatprep.subr.bf16.mxu1 %v549_v38  ;;  %v653_v38 = vld [vmem:[%s992_s4 + $0x40] sm:$0xff]   ;;  %v664_v61 = vld [vmem:[%s992_s4 + $0x28] sm:$0xff]  }
  0x1b   :  { %v261_v13 = vld [vmem:[%s993_s1] sm:$0x3] }
  0x1c   :  { %v277_v21 = vld [vmem:[%s994_s2] sm:$0x3] }
  0x1d   :  { %552 = vmatpush1.bf16.msra.mxu0 %v551_v45  ;;  %616 = vmatpush1.bf16.msra.mxu1 %v551_v45 }
  0x1e   :  { %554 = vmatprep.subr.bf16.mxu0 %v553_v46  ;;  %618 = vmatprep.subr.bf16.mxu1 %v553_v46 }
  0x21   :  { %556 = vmatpush1.bf16.msra.mxu0 %v555_v51  ;;  %620 = vmatpush1.bf16.msra.mxu1 %v555_v51 }
  0x22   :  { %558 = vmatprep.subr.bf16.mxu0 %v557_v52  ;;  %622 = vmatprep.subr.bf16.mxu1 %v557_v52 }
  0x25   :  { %560 = vmatpush1.bf16.msra.mxu0 %v559_v57  ;;  %624 = vmatpush1.bf16.msra.mxu1 %v559_v57  ;;  %v660_v57 = vld [vmem:[%s992_s4 + $0x18] sm:$0xff]  }
  0x26   :  { %562 = vmatprep.subr.bf16.mxu0 %v561_v58  ;;  %626 = vmatprep.subr.bf16.mxu1 %v561_v58  ;;  %v661_v58 = vld [vmem:[%s992_s4 + $0x60] sm:$0xff]  }
  0x29   :  { %564 = vmatpush1.bf16.msra.mxu0 %v563_v63  ;;  %628 = vmatpush1.bf16.msra.mxu1 %v563_v63  ;;  %v666_v63 = vld [vmem:[%s992_s4 + $0x30] sm:$0xff]  }
  0x2a   :  { %566 = vmatprep.subr.bf16.mxu0 %v565_v0  ;;  %630 = vmatprep.subr.bf16.mxu1 %v565_v0  ;;  %v667_v0 = vld [vmem:[%s992_s4 + $0x78] sm:$0xff]  }
  0x2d   :  { %568 = vmatpush1.bf16.msra.mxu0 %v567_v5  ;;  %632 = vmatpush1.bf16.msra.mxu1 %v567_v5 }
  0x2e   :  { %570 = vmatprep.subr.bf16.mxu0 %v569_v6  ;;  %634 = vmatprep.subr.bf16.mxu1 %v569_v6  ;;  %v263_v6 = vlaneseq }
  0x31   :  { %572 = vmatpush1.bf16.msra.mxu0 %v571_v11  ;;  %636 = vmatpush1.bf16.msra.mxu1 %v571_v11  ;;  %v264_v11 = vshrl.u32 %v263_v6, 7 }
  0x32   :  { %574 = vmatprep.subr.bf16.mxu0 %v573_v12  ;;  %638 = vmatprep.subr.bf16.mxu1 %v573_v12 }
  0x33   :  { %v265_v12 = vsub.s32 0, %v264_v11  ;;  %v269_v14 = vsub.s32 1, %v264_v11 }
  0x35   :  { %576 = vmatpush1.bf16.msra.mxu0 %v575_v17  ;;  %640 = vmatpush1.bf16.msra.mxu1 %v575_v17  ;;  %v270_v20 = vrot.slane %v261_v13, %v269_v14  ;;  %v282_v26 = vrot.slane %v277_v21, %v265_v12 }
  0x36   :  { %578 = vmatprep.subr.bf16.mxu0 %v577_v18  ;;  %642 = vmatprep.subr.bf16.mxu1 %v577_v18  ;;  %v266_v18 = vrot.slane %v261_v13, %v265_v12 }
  0x39   :  { %580 = vmatpush1.bf16.msra.mxu0 %v579_v23  ;;  %644 = vmatpush1.bf16.msra.mxu1 %v579_v23 }
  0x3a   :  { %582 = vmatprep.subr.bf16.mxu0 %v581_v24  ;;  %646 = vmatprep.subr.bf16.mxu1 %v581_v24 }
  0x3d   :  { %584 = vmatpush1.bf16.msra.mxu0 %v583_v29  ;;  %648 = vmatpush1.bf16.msra.mxu1 %v583_v29  ;;  %v286_v29 = vrot.slane %v277_v21, %v269_v14 }
  0x3e   :  { %586 = vmatprep.subr.bf16.mxu0 %v585_v30  ;;  %650 = vmatprep.subr.bf16.mxu1 %v585_v30 }
  0x41   :  { %588 = vmatpush1.bf16.msra.mxu0 %v587_v33  ;;  %652 = vmatpush1.bf16.msra.mxu1 %v587_v33 }
  0x42   :  { %503 = vmatprep.subr.bf16.mxu0 %v653_v38 }
  0x44   :  { %156 = vmatmul.mubr.f32.vlgmr.msra.gmra.mrb[0].mxu0 %v23_v35 }
  0x45   :  { %161 = vmatprep.mubr.f32.mxu0 %v26_v36  ;;  %504 = vmatpush3.bf16.msra.mxu0 %v654_v39 }
  0x48   :  { %162 = vmatmul.mubr.f32.gmra.mrb[2].mxu0 %v25_v37 }
 0x117   :  { %v157_v40 = vpop.f32.mrb[0].mxu0 }
 0x118   :  { %v917_v42 = vsub.f32 %v23_v35, %v157_v40  ;;  %v159_v43 = vpop.f32.mrb[1].mxu0 }
 0x119   :  { %v921_v45 = vsub.f32 %v24_v44, %v159_v43  ;;  %v655_v44 = vld [vmem:[%s992_s4 + $0x48] sm:$0xff]  }
 0x11a   :  { %v172_v48 = vmul.f32 %v917_v42, %v917_v42  ;;  %505 = vmatprep.subr.bf16.mxu0 %v655_v44 }
 0x11b   :  { %v163_v46 = vpop.f32.mrb[2].mxu0  ;;  %v173_v47 = vmul.f32 %v921_v45, %v921_v45  ;;  %506 = vmatpush3.bf16.msra.mxu0 %v656_v53 }
 0x11c   :  { %v927_v49 = vsub.f32 %v25_v37, %v163_v46  ;;  %v165_v50 = vpop.f32.mrb[3].mxu0  ;;  %507 = vmatprep.subr.bf16.mxu0 %v657_v54 }
 0x11d   :  { %v929_v51 = vsub.f32 %v26_v36, %v165_v50  ;;  %240 = vmatprep.mubr.f32.mxu1 %v173_v47 }
 0x11e   :  { %241 = vmatmul.mubr.f32.vlgmr.msra.gmra.mrb[0].mxu1 %v172_v48  ;;  %v174_v41 = vmul.f32 %v927_v49, %v927_v49 }
 0x11f   :  { %v175_v52 = vmul.f32 %v929_v51, %v929_v51  ;;  %508 = vmatpush3.bf16.msra.mxu0 %v658_v55 }
 0x120   :  { %509 = vmatprep.subr.bf16.mxu0 %v659_v56 }
 0x121   :  { %246 = vmatprep.mubr.f32.mxu1 %v175_v52 }
 0x122   :  { %247 = vmatmul.mubr.f32.gmra.mrb[2].mxu1 %v174_v41 }
 0x123   :  { %510 = vmatpush3.bf16.msra.mxu0 %v660_v57 }
 0x124   :  { %511 = vmatprep.subr.bf16.mxu0 %v661_v58 }
 0x127   :  { %512 = vmatpush3.bf16.msra.mxu0 %v662_v59 }
 0x128   :  { %513 = vmatprep.subr.bf16.mxu0 %v663_v60 }
 0x12b   :  { %514 = vmatpush3.bf16.msra.mxu0 %v664_v61 }
 0x12c   :  { %515 = vmatprep.subr.bf16.mxu0 %v665_v62 }
 0x12f   :  { %516 = vmatpush3.bf16.msra.mxu0 %v666_v63 }
 0x130   :  { %517 = vmatprep.subr.bf16.mxu0 %v667_v0 }
 0x133   :  { %518 = vmatpush3.bf16.msra.mxu0 %v668_v1 }
 0x1f1   :  { %v242_v2 = vpop.f32.mrb[0].mxu1 }
 0x1f2   :  { %v243_v3 = vadd.f32 1e-05, %v242_v2  ;;  %v244_v4 = vpop.f32.mrb[1].mxu1 }
 0x1f3   :  { %v245_v5 = vadd.f32 1e-05, %v244_v4 }
 0x1f4   :  { %669 = vrsqrt.f32 %v243_v3 }
 0x1f5   :  { %671 = vrsqrt.f32 %v245_v5  ;;  %v248_v7 = vpop.f32.mrb[2].mxu1 }
 0x1f6   :  { %v249_v8 = vadd.f32 1e-05, %v248_v7  ;;  %v250_v9 = vpop.f32.mrb[3].mxu1 }
 0x1f7   :  { %v251_v10 = vadd.f32 1e-05, %v250_v9 }
 0x1f8   :  { %673 = vrsqrt.f32 %v249_v8 }
 0x1f9   :  { %675 = vrsqrt.f32 %v251_v10 }
 0x1fe   :  { %v670_v15 = vpop.eup %669 }
 0x1ff   :  { %v672_v16 = vpop.eup %671  ;;  %v257_v17 = vmul.f32 %v670_v15, %v917_v42 }
 0x200   :  { %v258_v19 = vmul.f32 %v672_v16, %v921_v45 }
 0x201   :  { %v273_v25 = vmul.f32 %v266_v18, %v257_v17 }
 0x202   :  { %v674_v22 = vpop.eup %673  ;;  %v274_v28 = vmul.f32 %v270_v20, %v258_v19 }
 0x203   :  { %v676_v23 = vpop.eup %675  ;;  %v259_v24 = vmul.f32 %v674_v22, %v927_v49  ;;  %v289_v32 = vadd.f32 %v282_v26, %v273_v25 }
 0x204   :  { %v260_v27 = vmul.f32 %v676_v23, %v929_v51  ;;  %v290_v34 = vadd.f32 %v286_v29, %v274_v28 }
 0x205   :  { %v275_v30 = vmul.f32 %v266_v18, %v259_v24 }
 0x206   :  { %v276_v31 = vmul.f32 %v270_v20, %v260_v27 }
 0x207   :  { %v291_v33 = vadd.f32 %v282_v26, %v275_v30 }
 0x208   :  { %v292_v35 = vadd.f32 %v286_v29, %v276_v31 }
 0x209   :  { %v293_v36 = vpack.c.bf16 %v291_v33, %v289_v32 }
 0x20a   :  { %v294_v37 = vpack.c.bf16 %v292_v35, %v290_v34 }
 0x20c   :  { %455 = vmatprep.mubr.bf16.mxu0 %v294_v37 }
 0x20d   :  { %456 = vmatmul.mubr.bf16.vlgmr.msra.gmra.mrb[4].mxu0 %v293_v36 }
 0x2e0   :  { %v519_v38 = vpop.f32.mrb[4].mxu0 }
 0x2e1   :  { %v520_v39 = vpop.f32.mrb[5].mxu0 }
 0x2e2   :  { %v521_v40 = vadd.f32 %v520_v39, %v519_v38  ;;  %v522_v42 = vpop.f32.mrb[6].mxu0 }
 0x2e3   :  { %v523_v43 = vpop.f32.mrb[7].mxu0 }
 0x2e4   :  { %v524_v45 = vadd.f32 %v523_v43, %v522_v42 }
 0x2e6   :  { %v501_v46 = vpack.c.bf16 %v524_v45, %v521_v40 }
 0x2e8   :  { %502 = vst [vmem:[%s995_s5] sm:$0xff] %v501_v46  }

// kernel: ultron_forward.8
= control target key start
LH: loop header
LB: loop body
LE: loop exit
PB: predicated region body
PF: predicated region fallthrough
CT: control target
= control target key end

     0   :  { %s918_s3 = inlined_call_operand.vmem [shape: f32[256,256], index: 3, kind: input, shape index: {}]   ;;  %s919_s0 = inlined_call_operand.vmem [shape: bf16[8,256], index: 0, kind: input, shape index: {}]   ;;  %s920_s4 = inlined_call_operand.vmem [shape: bf16[256,128], index: 4, kind: input, shape index: {}]   ;;  %s921_s1 = inlined_call_operand.vmem [shape: f32[1,256], index: 1, kind: input, shape index: {}]   ;;  %s922_s2 = inlined_call_operand.vmem [shape: f32[1,256], index: 2, kind: input, shape index: {}]   ;;  %s923_s5 = inlined_call_operand.vmem [shape: bf16[8,128], index: 5, kind: output, shape index: {}]  }
   0x1   :  { %v25_v0 = vld [vmem:[%s918_s3 + $0x8] sm:$0xff]  ;;  %v27_v1 = vld [vmem:[%s918_s3 + $0x18] sm:$0xff]  ;;  %v24_v2 = vld [vmem:[%s918_s3] sm:$0xff] }
   0x2   :  { %v480_v3 = vpack.c.bf16 %v27_v1, %v25_v0  ;;  %v26_v4 = vld [vmem:[%s918_s3 + $0x10] sm:$0xff]  ;;  %v29_v5 = vld [vmem:[%s918_s3 + $0x28] sm:$0xff]  ;;  %v31_v6 = vld [vmem:[%s918_s3 + $0x38] sm:$0xff] }
   0x3   :  { %v482_v7 = vpack.c.bf16 %v26_v4, %v24_v2  ;;  %v484_v8 = vpack.c.bf16 %v31_v6, %v29_v5  ;;  %v28_v9 = vld [vmem:[%s918_s3 + $0x20] sm:$0xff]  ;;  %v30_v10 = vld [vmem:[%s918_s3 + $0x30] sm:$0xff]  ;;  %v33_v11 = vld [vmem:[%s918_s3 + $0x48] sm:$0xff] }
   0x4   :  { %481 = vmatprep.subr.bf16.mxu0 %v480_v3  ;;  %v35_v12 = vld [vmem:[%s918_s3 + $0x58] sm:$0xff]  ;;  %545 = vmatprep.subr.bf16.mxu1 %v480_v3  ;;  %v486_v13 = vpack.c.bf16 %v30_v10, %v28_v9  ;;  %v32_v15 = vld [vmem:[%s918_s3 + $0x40] sm:$0xff]  ;;  %v34_v16 = vld [vmem:[%s918_s3 + $0x50] sm:$0xff] }
   0x5   :  { %483 = vmatpush1.bf16.msra.mxu0 %v482_v7  ;;  %547 = vmatpush1.bf16.msra.mxu1 %v482_v7  ;;  %v488_v14 = vpack.c.bf16 %v35_v12, %v33_v11  ;;  %v37_v17 = vld [vmem:[%s918_s3 + $0x68] sm:$0xff]  ;;  %v39_v18 = vld [vmem:[%s918_s3 + $0x78] sm:$0xff]  ;;  %v490_v19 = vpack.c.bf16 %v34_v16, %v32_v15  ;;  %v36_v21 = vld [vmem:[%s918_s3 + $0x60] sm:$0xff] }
   0x6   :  { %485 = vmatprep.subr.bf16.mxu0 %v484_v8  ;;  %549 = vmatprep.subr.bf16.mxu1 %v484_v8  ;;  %v492_v20 = vpack.c.bf16 %v39_v18, %v37_v17  ;;  %v38_v22 = vld [vmem:[%s918_s3 + $0x70] sm:$0xff]  ;;  %v41_v23 = vld [vmem:[%s918_s3 + $0x88] sm:$0xff]  ;;  %v43_v24 = vld [vmem:[%s918_s3 + $0x98] sm:$0xff] }
   0x7   :  { %v494_v25 = vpack.c.bf16 %v38_v22, %v36_v21  ;;  %v496_v26 = vpack.c.bf16 %v43_v24, %v41_v23  ;;  %v40_v27 = vld [vmem:[%s918_s3 + $0x80] sm:$0xff]  ;;  %v42_v28 = vld [vmem:[%s918_s3 + $0x90] sm:$0xff]  ;;  %v45_v29 = vld [vmem:[%s918_s3 + $0xa8] sm:$0xff] }
   0x8   :  { %v47_v30 = vld [vmem:[%s918_s3 + $0xb8] sm:$0xff]  ;;  %v498_v31 = vpack.c.bf16 %v42_v28, %v40_v27  ;;  %v44_v33 = vld [vmem:[%s918_s3 + $0xa0] sm:$0xff]  ;;  %v46_v34 = vld [vmem:[%s918_s3 + $0xb0] sm:$0xff] }
   0x9   :  { %487 = vmatpush1.bf16.msra.mxu0 %v486_v13  ;;  %551 = vmatpush1.bf16.msra.mxu1 %v486_v13  ;;  %v500_v32 = vpack.c.bf16 %v47_v30, %v45_v29  ;;  %v49_v35 = vld [vmem:[%s918_s3 + $0xc8] sm:$0xff]  ;;  %v51_v36 = vld [vmem:[%s918_s3 + $0xd8] sm:$0xff]  ;;  %v502_v37 = vpack.c.bf16 %v46_v34, %v44_v33  ;;  %v48_v39 = vld [vmem:[%s918_s3 + $0xc0] sm:$0xff] }
   0xa   :  { %489 = vmatprep.subr.bf16.mxu0 %v488_v14  ;;  %553 = vmatprep.subr.bf16.mxu1 %v488_v14  ;;  %v504_v38 = vpack.c.bf16 %v51_v36, %v49_v35  ;;  %v50_v40 = vld [vmem:[%s918_s3 + $0xd0] sm:$0xff]  ;;  %v745_v41 = vld [vmem:[%s919_s0] sm:$0xff]  ;;  %v53_v42 = vld [vmem:[%s918_s3 + $0xe8] sm:$0xff] }
   0xb   :  { %v55_v43 = vld [vmem:[%s918_s3 + $0xf8] sm:$0xff]  ;;  %v23_v44 = vunpack.c.h.bf16 %v745_v41  ;;  %v506_v45 = vpack.c.bf16 %v50_v40, %v48_v39  ;;  %v52_v47 = vld [vmem:[%s918_s3 + $0xe0] sm:$0xff]  ;;  %v54_v48 = vld [vmem:[%s918_s3 + $0xf0] sm:$0xff]  ;;  %v22_v34 = vunpack.c.l.bf16 %v745_v41 }
   0xc   :  { %v508_v46 = vpack.c.bf16 %v55_v43, %v53_v42  ;;  %v57_v49 = vld [vmem:[%s918_s3 + $0x108] sm:$0xff]  ;;  %v59_v50 = vld [vmem:[%s918_s3 + $0x118] sm:$0xff]  ;;  %v510_v51 = vpack.c.bf16 %v54_v48, %v52_v47  ;;  %v56_v53 = vld [vmem:[%s918_s3 + $0x100] sm:$0xff] }
   0xd   :  { %491 = vmatpush1.bf16.msra.mxu0 %v490_v19  ;;  %555 = vmatpush1.bf16.msra.mxu1 %v490_v19  ;;  %v512_v52 = vpack.c.bf16 %v59_v50, %v57_v49  ;;  %v58_v54 = vld [vmem:[%s918_s3 + $0x110] sm:$0xff]  ;;  %v61_v55 = vld [vmem:[%s918_s3 + $0x128] sm:$0xff]  ;;  %v63_v56 = vld [vmem:[%s918_s3 + $0x138] sm:$0xff] }
   0xe   :  { %493 = vmatprep.subr.bf16.mxu0 %v492_v20  ;;  %557 = vmatprep.subr.bf16.mxu1 %v492_v20  ;;  %v514_v57 = vpack.c.bf16 %v58_v54, %v56_v53  ;;  %v516_v58 = vpack.c.bf16 %v63_v56, %v61_v55  ;;  %v60_v59 = vld [vmem:[%s918_s3 + $0x120] sm:$0xff]  ;;  %v62_v60 = vld [vmem:[%s918_s3 + $0x130] sm:$0xff]  ;;  %v65_v61 = vld [vmem:[%s918_s3 + $0x148] sm:$0xff] }
   0xf   :  { %152 = vmatprep.mubr.f32.mxu0 %v23_v44  ;;  %v67_v62 = vld [vmem:[%s918_s3 + $0x158] sm:$0xff]  ;;  %v518_v63 = vpack.c.bf16 %v62_v60, %v60_v59  ;;  %v64_v1 = vld [vmem:[%s918_s3 + $0x140] sm:$0xff]  ;;  %v66_v2 = vld [vmem:[%s918_s3 + $0x150] sm:$0xff] }
  0x10   :  { %v520_v0 = vpack.c.bf16 %v67_v62, %v65_v61  ;;  %v69_v3 = vld [vmem:[%s918_s3 + $0x168] sm:$0xff]  ;;  %v71_v4 = vld [vmem:[%s918_s3 + $0x178] sm:$0xff]  ;;  %v522_v5 = vpack.c.bf16 %v66_v2, %v64_v1  ;;  %v68_v7 = vld [vmem:[%s918_s3 + $0x160] sm:$0xff] }
  0x11   :  { %495 = vmatpush1.bf16.msra.mxu0 %v494_v25  ;;  %559 = vmatpush1.bf16.msra.mxu1 %v494_v25  ;;  %v524_v6 = vpack.c.bf16 %v71_v4, %v69_v3  ;;  %v70_v8 = vld [vmem:[%s918_s3 + $0x170] sm:$0xff]  ;;  %v73_v9 = vld [vmem:[%s918_s3 + $0x188] sm:$0xff]  ;;  %v75_v10 = vld [vmem:[%s918_s3 + $0x198] sm:$0xff] }
  0x12   :  { %497 = vmatprep.subr.bf16.mxu0 %v496_v26  ;;  %561 = vmatprep.subr.bf16.mxu1 %v496_v26  ;;  %v526_v11 = vpack.c.bf16 %v70_v8, %v68_v7  ;;  %v528_v12 = vpack.c.bf16 %v75_v10, %v73_v9  ;;  %v72_v13 = vld [vmem:[%s918_s3 + $0x180] sm:$0xff]  ;;  %v74_v14 = vld [vmem:[%s918_s3 + $0x190] sm:$0xff]  ;;  %v77_v15 = vld [vmem:[%s918_s3 + $0x1a8] sm:$0xff] }
  0x13   :  { %v79_v16 = vld [vmem:[%s918_s3 + $0x1b8] sm:$0xff]  ;;  %v530_v17 = vpack.c.bf16 %v74_v14, %v72_v13  ;;  %v76_v19 = vld [vmem:[%s918_s3 + $0x1a0] sm:$0xff]  ;;  %v78_v20 = vld [vmem:[%s918_s3 + $0x1b0] sm:$0xff] }
  0x14   :  { %v532_v18 = vpack.c.bf16 %v79_v16, %v77_v15  ;;  %v81_v21 = vld [vmem:[%s918_s3 + $0x1c8] sm:$0xff]  ;;  %v83_v22 = vld [vmem:[%s918_s3 + $0x1d8] sm:$0xff]  ;;  %v534_v23 = vpack.c.bf16 %v78_v20, %v76_v19  ;;  %v80_v25 = vld [vmem:[%s918_s3 + $0x1c0] sm:$0xff] }
  0x15   :  { %499 = vmatpush1.bf16.msra.mxu0 %v498_v31  ;;  %563 = vmatpush1.bf16.msra.mxu1 %v498_v31  ;;  %v536_v24 = vpack.c.bf16 %v83_v22, %v81_v21  ;;  %v82_v26 = vld [vmem:[%s918_s3 + $0x1d0] sm:$0xff]  ;;  %v85_v27 = vld [vmem:[%s918_s3 + $0x1e8] sm:$0xff]  ;;  %v87_v28 = vld [vmem:[%s918_s3 + $0x1f8] sm:$0xff] }
  0x16   :  { %501 = vmatprep.subr.bf16.mxu0 %v500_v32  ;;  %565 = vmatprep.subr.bf16.mxu1 %v500_v32  ;;  %v538_v29 = vpack.c.bf16 %v82_v26, %v80_v25  ;;  %v540_v30 = vpack.c.bf16 %v87_v28, %v85_v27  ;;  %v84_v31 = vld [vmem:[%s918_s3 + $0x1e0] sm:$0xff]  ;;  %v86_v32 = vld [vmem:[%s918_s3 + $0x1f0] sm:$0xff]  ;;  %v614_v49 = vld [vmem:[%s920_s4 + $0x58] sm:$0xff]  }
  0x17   :  { %v542_v33 = vpack.c.bf16 %v86_v32, %v84_v31  ;;  %v608_v35 = vld [vmem:[%s920_s4 + $0x40] sm:$0xff]   ;;  %v612_v47 = vld [vmem:[%s920_s4 + $0x50] sm:$0xff]   ;;  %v615_v41 = vld [vmem:[%s920_s4 + $0x18] sm:$0xff]  }
  0x18   :  { %v609_v36 = vld [vmem:[%s920_s4] sm:$0xff]   ;;  %v613_v48 = vld [vmem:[%s920_s4 + $0x10] sm:$0xff]   ;;  %v622_v55 = vld [vmem:[%s920_s4 + $0x78] sm:$0xff]  }
  0x19   :  { %503 = vmatpush1.bf16.msra.mxu0 %v502_v37  ;;  %567 = vmatpush1.bf16.msra.mxu1 %v502_v37  ;;  %v610_v37 = vld [vmem:[%s920_s4 + $0x48] sm:$0xff]   ;;  %v617_v50 = vld [vmem:[%s920_s4 + $0x20] sm:$0xff]   ;;  %v620_v53 = vld [vmem:[%s920_s4 + $0x70] sm:$0xff]  }
  0x1a   :  { %505 = vmatprep.subr.bf16.mxu0 %v504_v38  ;;  %569 = vmatprep.subr.bf16.mxu1 %v504_v38  ;;  %v611_v38 = vld [vmem:[%s920_s4 + $0x8] sm:$0xff]   ;;  %v621_v54 = vld [vmem:[%s920_s4 + $0x30] sm:$0xff]   ;;  %v623_v56 = vld [vmem:[%s920_s4 + $0x38] sm:$0xff]  }
  0x1b   :  { %v252_v2 = vld [vmem:[%s922_s2] sm:$0x3] }
  0x1d   :  { %507 = vmatpush1.bf16.msra.mxu0 %v506_v45  ;;  %571 = vmatpush1.bf16.msra.mxu1 %v506_v45 }
  0x1e   :  { %509 = vmatprep.subr.bf16.mxu0 %v508_v46  ;;  %573 = vmatprep.subr.bf16.mxu1 %v508_v46 }
  0x21   :  { %511 = vmatpush1.bf16.msra.mxu0 %v510_v51  ;;  %575 = vmatpush1.bf16.msra.mxu1 %v510_v51  ;;  %v618_v51 = vld [vmem:[%s920_s4 + $0x68] sm:$0xff]  }
  0x22   :  { %513 = vmatprep.subr.bf16.mxu0 %v512_v52  ;;  %577 = vmatprep.subr.bf16.mxu1 %v512_v52  ;;  %v619_v52 = vld [vmem:[%s920_s4 + $0x28] sm:$0xff]  }
  0x25   :  { %515 = vmatpush1.bf16.msra.mxu0 %v514_v57  ;;  %579 = vmatpush1.bf16.msra.mxu1 %v514_v57 }
  0x26   :  { %517 = vmatprep.subr.bf16.mxu0 %v516_v58  ;;  %581 = vmatprep.subr.bf16.mxu1 %v516_v58  ;;  %v240_v58 = vlaneseq }
  0x28   :  { %v241_v62 = vshrl.u32 %v240_v58, 7 }
  0x29   :  { %519 = vmatpush1.bf16.msra.mxu0 %v518_v63  ;;  %583 = vmatpush1.bf16.msra.mxu1 %v518_v63 }
  0x2a   :  { %521 = vmatprep.subr.bf16.mxu0 %v520_v0  ;;  %585 = vmatprep.subr.bf16.mxu1 %v520_v0  ;;  %v242_v63 = vsub.s32 0, %v241_v62  ;;  %v238_v0 = vld [vmem:[%s921_s1] sm:$0x3]  ;;  %v246_v1 = vsub.s32 1, %v241_v62 }
  0x2c   :  { %v243_v3 = vrot.slane %v238_v0, %v242_v63  ;;  %v257_v7 = vrot.slane %v252_v2, %v242_v63  ;;  %v261_v10 = vrot.slane %v252_v2, %v246_v1 }
  0x2d   :  { %523 = vmatpush1.bf16.msra.mxu0 %v522_v5  ;;  %587 = vmatpush1.bf16.msra.mxu1 %v522_v5  ;;  %v247_v5 = vrot.slane %v238_v0, %v246_v1 }
  0x2e   :  { %525 = vmatprep.subr.bf16.mxu0 %v524_v6  ;;  %589 = vmatprep.subr.bf16.mxu1 %v524_v6 }
  0x31   :  { %527 = vmatpush1.bf16.msra.mxu0 %v526_v11  ;;  %591 = vmatpush1.bf16.msra.mxu1 %v526_v11 }
  0x32   :  { %529 = vmatprep.subr.bf16.mxu0 %v528_v12  ;;  %593 = vmatprep.subr.bf16.mxu1 %v528_v12 }
  0x35   :  { %531 = vmatpush1.bf16.msra.mxu0 %v530_v17  ;;  %595 = vmatpush1.bf16.msra.mxu1 %v530_v17 }
  0x36   :  { %533 = vmatprep.subr.bf16.mxu0 %v532_v18  ;;  %597 = vmatprep.subr.bf16.mxu1 %v532_v18 }
  0x39   :  { %535 = vmatpush1.bf16.msra.mxu0 %v534_v23  ;;  %599 = vmatpush1.bf16.msra.mxu1 %v534_v23 }
  0x3a   :  { %537 = vmatprep.subr.bf16.mxu0 %v536_v24  ;;  %601 = vmatprep.subr.bf16.mxu1 %v536_v24 }
  0x3d   :  { %539 = vmatpush1.bf16.msra.mxu0 %v538_v29  ;;  %603 = vmatpush1.bf16.msra.mxu1 %v538_v29 }
  0x3e   :  { %541 = vmatprep.subr.bf16.mxu0 %v540_v30  ;;  %605 = vmatprep.subr.bf16.mxu1 %v540_v30 }
  0x41   :  { %543 = vmatpush1.bf16.msra.mxu0 %v542_v33  ;;  %607 = vmatpush1.bf16.msra.mxu1 %v542_v33 }
  0x42   :  { %458 = vmatprep.subr.bf16.mxu0 %v608_v35 }
  0x44   :  { %153 = vmatmul.mubr.f32.vlgmr.msra.gmra.mrb[0].mxu0 %v22_v34 }
  0x45   :  { %459 = vmatpush3.bf16.msra.mxu0 %v609_v36 }
  0x46   :  { %460 = vmatprep.subr.bf16.mxu0 %v610_v37 }
  0x49   :  { %461 = vmatpush3.bf16.msra.mxu0 %v611_v38 }
  0x4a   :  { %462 = vmatprep.subr.bf16.mxu0 %v612_v47 }
  0x4d   :  { %463 = vmatpush3.bf16.msra.mxu0 %v613_v48 }
  0x4e   :  { %464 = vmatprep.subr.bf16.mxu0 %v614_v49 }
  0x51   :  { %465 = vmatpush3.bf16.msra.mxu0 %v615_v41 }
 0x117   :  { %v154_v39 = vpop.f32.mrb[0].mxu0 }
 0x118   :  { %v159_v40 = vsub.f32 %v22_v34, %v154_v39  ;;  %v156_v42 = vpop.f32.mrb[1].mxu0 }
 0x119   :  { %v160_v43 = vsub.f32 %v23_v44, %v156_v42  ;;  %v616_v44 = vld [vmem:[%s920_s4 + $0x60] sm:$0xff]  }
 0x11a   :  { %v161_v46 = vmul.f32 %v159_v40, %v159_v40  ;;  %466 = vmatprep.subr.bf16.mxu0 %v616_v44 }
 0x11b   :  { %v162_v45 = vmul.f32 %v160_v43, %v160_v43  ;;  %467 = vmatpush3.bf16.msra.mxu0 %v617_v50 }
 0x11c   :  { %468 = vmatprep.subr.bf16.mxu0 %v618_v51 }
 0x11d   :  { %227 = vmatprep.mubr.f32.mxu1 %v162_v45 }
 0x11e   :  { %228 = vmatmul.mubr.f32.vlgmr.msra.gmra.mrb[0].mxu1 %v161_v46 }
 0x11f   :  { %469 = vmatpush3.bf16.msra.mxu0 %v619_v52 }
 0x120   :  { %470 = vmatprep.subr.bf16.mxu0 %v620_v53 }
 0x123   :  { %471 = vmatpush3.bf16.msra.mxu0 %v621_v54 }
 0x124   :  { %472 = vmatprep.subr.bf16.mxu0 %v622_v55 }
 0x127   :  { %473 = vmatpush3.bf16.msra.mxu0 %v623_v56 }
 0x1f1   :  { %v229_v57 = vpop.f32.mrb[0].mxu1 }
 0x1f2   :  { %v230_v59 = vadd.f32 1e-05, %v229_v57  ;;  %v231_v60 = vpop.f32.mrb[1].mxu1 }
 0x1f3   :  { %v232_v61 = vadd.f32 1e-05, %v231_v60 }
 0x1f4   :  { %624 = vrsqrt.f32 %v230_v59 }
 0x1f5   :  { %626 = vrsqrt.f32 %v232_v61 }
 0x1fe   :  { %v625_v4 = vpop.eup %624 }
 0x1ff   :  { %v627_v6 = vpop.eup %626  ;;  %v236_v8 = vmul.f32 %v625_v4, %v159_v40 }
 0x200   :  { %v237_v9 = vmul.f32 %v627_v6, %v160_v43 }
 0x201   :  { %v250_v11 = vmul.f32 %v243_v3, %v236_v8 }
 0x202   :  { %v251_v12 = vmul.f32 %v247_v5, %v237_v9 }
 0x203   :  { %v264_v13 = vadd.f32 %v257_v7, %v250_v11 }
 0x204   :  { %v265_v14 = vadd.f32 %v261_v10, %v251_v12 }
 0x205   :  { %v266_v16 = vpack.c.bf16 %v264_v13, %v264_v13 }
 0x206   :  { %v267_v15 = vpack.c.bf16 %v265_v14, %v265_v14 }
 0x208   :  { %428 = vmatprep.mubr.bf16.mxu0 %v267_v15 }
 0x209   :  { %429 = vmatmul.mubr.bf16.vlgmr.msra.gmra.mrb[4].mxu0 %v266_v16 }
 0x2dc   :  { %v474_v17 = vpop.f32.mrb[4].mxu0 }
 0x2dd   :  { %v475_v18 = vpop.f32.mrb[5].mxu0 }
 0x2de   :  { %v476_v19 = vadd.f32 %v475_v18, %v474_v17  ;;  %v477_v20 = vpop.f32.mrb[6].mxu0 }
 0x2df   :  { %v478_v21 = vpop.f32.mrb[7].mxu0 }
 0x2e0   :  { %v436_v22 = vpack.c.bf16 %v476_v19, %v476_v19 }
 0x2e2   :  { %437 = vst [vmem:[%s923_s5] sm:$0xf] %v436_v22 }

// kernel: ultron_forward.9
= control target key start
LH: loop header
LB: loop body
LE: loop exit
PB: predicated region body
PF: predicated region fallthrough
CT: control target
= control target key end

     0   :  { %s1077_s0 = inlined_call_operand.<no memory space> [shape: f32[1,1], index: 0, kind: input, shape index: {}]   ;;  %s1078_s1 = inlined_call_operand.vmem [shape: bf16[2,4,128], index: 1, kind: input, shape index: {}]   ;;  %s1079_s2 = inlined_call_operand.vmem [shape: bf16[128,128], index: 2, kind: input, shape index: {}]   ;;  %s1080_s3 = inlined_call_operand.vmem [shape: f32[1,128], index: 3, kind: input, shape index: {}]   ;;  %s1081_s4 = inlined_call_operand.vmem [shape: bf16[128,10], index: 4, kind: input, shape index: {}]   ;;  %s1082_s5 = inlined_call_operand.vmem [shape: f32[1,10], index: 5, kind: input, shape index: {}]   ;;  %s1083_s6 = inlined_call_operand.hbm [shape: f32[2,1,10], index: 6, kind: output, shape index: {}]  }
   0x1   :  { %v11_v0 = vstv %s1077_s0 }
   0x2   :  { %12 = vst [vmem:[#allocation2] sm:$0x1] %v11_v0 }
   0x3   :  { %13 = vsyncpa [#allocation4], 0 }
   0x4   :  { %15 = vsyncpa [#allocation4 + $0x1], 0  ;;  %s890_s23 = smov 0   ;;  %s892_s24 = smov 0  }
   0x5   :  { %s894_s25 = smov 0   ;;  %s896_s26 = smov 0  }
   0x6 LB: > { %s911_s0 = sadd.s32 4294967295, %s846_s26   ;;  %s625_s27 = sadd.s32 4294967294, %s846_s26   ;;  %s846_s26 = sphi %s896_s26, %s1089_s26   ;;  %s842_s25 = sphi %s894_s25, %s1088_s25   ;;  %s838_s24 = sphi %s892_s24, %s1087_s24   ;;  %s834_s23 = sphi %s890_s23, %s1086_s23  }
   0x7   : > { %s915_s28 = sadd.s32 1, %s846_s26   ;;  %s159_s29 = sadd.s32 1, %s842_s25 }
   0x8   : > { %s156_s30 = ssub.s32 %s846_s26, %s915_s28  ;;  %p169_p0 = scmp.ne.s32.totalorder %s842_s25, %s838_s24 }
   0x9   : > { %p157_p1 = scmp.eq.s32.totalorder %s156_s30, 0  ;;  %p170_p2 = scmp.eq.s32.totalorder %s911_s0, 1 }
   0xa   : > { %p175_p3 = scmp.ne.s32.totalorder %s838_s24, %s834_s23  ;;  %p176_p4 = scmp.eq.s32.totalorder %s625_s27, 1 }
   0xb   : > { %s926_s7 = scalar_select %p157_p1, %s842_s25, %s159_s29  }
   0xc   : > { %p928_p5 = por %p170_p2, %p169_p0  ;;  %p932_p6 = por %p176_p4, %p175_p3 }
   0xd   : > { %p628_p7 = scmp.ge.s32.totalorder %s846_s26, 1  ;;  %p216_p8 = scmp.lt.s32.totalorder %s846_s26, 3 }
   0xf   : > { %p217_p9 = pnand %p628_p7, %p216_p8 }
  0x10   : > { %v251_v1 = vld [vmem:[#allocation2] sm:$0x1] (!%p217_p9)  ;;  %v258_v2 = vlaneseq (!%p217_p9)  ;;  %v848_v3 = vmov (!%p217_p9), 0   ;;  %v849_v10 = vmov (!%p217_p9), 0.0   ;;  %vm850_vm0 = vmmov (!%p217_p9), 0   ;;  %v751_v11 = vld [vmem:[%s1079_s2 + $0x8] sm:$0xff] (!%p217_p9)  }
  0x11   : > { %220 = sbr.rel (%p217_p9) target bundleno = 1050 (0x41a), region = 44  ;;  %749 = vset.pattern.permute.xlu0 (!%p217_p9), %v848_v3  ;;  %v252_v4 = vmax.f32 (!%p217_p9), %v251_v1, 1e-07  ;;  %v750_v9 = vld [vmem:[%s1079_s2] sm:$0xff] (!%p217_p9)   ;;  %667 = vmatprep.subr.bf16.mxu0 (!%p217_p9), %v849_v10  ;;  %v752_v12 = vld [vmem:[%s1079_s2 + $0x10] sm:$0xff] (!%p217_p9)   ;;  %v753_v13 = vld [vmem:[%s1079_s2 + $0x18] sm:$0xff] (!%p217_p9)  }
  0x12   : > { %v259_v5 = vshrl.u32 (!%p217_p9), %v258_v2, 7  ;;  %683 = vmatprep.mubr.msk.bf16.mxu0 (!%p217_p9), %vm850_vm0, %v849_v10  ;;  %668 = vmatpush3.bf16.msra.mxu0 (!%p217_p9), %v750_v9  ;;  %v754_v14 = vld [vmem:[%s1079_s2 + $0x20] sm:$0xff] (!%p217_p9)   ;;  %v755_v15 = vld [vmem:[%s1079_s2 + $0x28] sm:$0xff] (!%p217_p9)   ;;  %v756_v16 = vld [vmem:[%s1079_s2 + $0x30] sm:$0xff] (!%p217_p9)   ;;  %p244_p10 = scmp.lt.s32.totalorder (!%p217_p9), %s911_s0, 1  ;;  %vm269_vm1 = vcmask (!%p217_p9), 1043456  }
  0x13   : > { %v253_v6 = vmin.f32 (!%p217_p9), %v252_v4, 100.0  ;;  %687 = vmatprep.subr.bf16.mxu1 (!%p217_p9), %v849_v10  ;;  %669 = vmatprep.subr.bf16.mxu0 (!%p217_p9), %v849_v10  ;;  %v757_v17 = vld [vmem:[%s1079_s2 + $0x38] sm:$0xff] (!%p217_p9)   ;;  %v310_v44 = vld [vmem:[%s1080_s3] sm:$0x1] (!%p217_p9)  ;;  %s242_s17 = sand.u32 (!%p217_p9), 1, %s838_s24   ;;  %s646_s20 = sshll.u32 (!%p217_p9), %s911_s0, 4 }
  0x14   : > { %v938_v7 = vsub.s32 (!%p217_p9), 0, %v259_v5  ;;  %703 = vmatprep.mubr.msk.bf16.mxu1 (!%p217_p9), %vm850_vm0, %v849_v10  ;;  %s243_s21 = scalar_lea.vmem (!%p217_p9), [#allocation3], %s242_s17  ;;  %vm555_vm4 = vcmask (!%p217_p9), 73728   ;;  %s1035_s30 = scalar_lea.hbm (!%p217_p9), %s1083_s6, %s646_s20 }
  0x15   : > { %s570_s22 = sshll.u32 (!%p217_p9), %s243_s21, 4  ;;  %s1037_s22 = int_to_ptr.vmem [resolvable:$true] %s570_s22 }
  0x16   : > { %v261_v8 = vrot.slane (!%p217_p9), %v253_v6, %v938_v7  ;;  %670 = vmatpush3.bf16.msra.mxu0 (!%p217_p9), %v751_v11 }
  0x17   : > { %671 = vmatprep.subr.bf16.mxu0 (!%p217_p9), %v849_v10 }
  0x18   : > { %263 = vperm.xlu0 %749, %v261_v8   ;;  %s245_s10 = scalar_select %p244_p10, %s911_s0, 1 }
  0x19   : > { %s558_s0 = scalar_lea.sflag [#allocation4], %s242_s17 }
  0x1a   : > { %672 = vmatpush3.bf16.msra.mxu0 %v752_v12  ;;  %s629_s11 = sshll.u32 %s245_s10, 1  ;;  %s784_s10 = scalar_lea.vmem %s1037_s22, 16 }
  0x1b   : > { %673 = vmatprep.subr.bf16.mxu0 %v849_v10  ;;  %s247_s14 = scalar_lea.vmem %s1078_s1, %s629_s11  ;;  %p785_p11 = scmp.ne.s32.totalorder %s1037_s22, %s784_s10 }
  0x1c   : > { %282 = vperm.xlu0 %749, %v253_v6   ;;  %v249_v18 = vld [vmem:[%s247_s14] sm:$0x3]  ;;  %s851_s11 = smov [#allocation3]  }
  0x1d   : > { %v981_v19 = vunpack.c.l.bf16 %v249_v18  ;;  %p786_p12 = pnand %p785_p11, %p928_p5  ;;  %s788_s12 = sshll.u32 %s851_s11, 4  ;;  %s789_s12 = int_to_ptr.vmem [resolvable:$false] %s788_s12 }
  0x1e   : > { %674 = vmatpush3.bf16.msra.mxu0 %v753_v13  ;;  %s790_s13 = scalar_lea.vmem %s789_s12, 32  ;;  %p791_p0 = scmp.lt.s32.totalorder %s1037_s22, %s789_s12 }
  0x1f   : > { %675 = vmatprep.subr.bf16.mxu0 %v849_v10  ;;  %v254_v20 = vmax.f32 %v981_v19, 1e-07  ;;  %p787_p13 = pneg %p786_p12  ;;  %p792_p1 = scmp.lt.s32.totalorder %s790_s13, %s784_s10 }
  0x21   : > { %766 = vlog2.f32 %v254_v20  ;;  %p793_p2 = por %p792_p1, %p791_p0 }
  0x22   : > { %676 = vmatpush3.bf16.msra.mxu0 %v754_v14 }
  0x23   : > { %677 = vmatprep.subr.bf16.mxu0 %v849_v10  ;;  %p794_p3 = pnand %p793_p2, %p787_p13 }
  0x26   : > { %678 = vmatpush3.bf16.msra.mxu0 %v755_v15 }
  0x27   : > { %679 = vmatprep.subr.bf16.mxu0 %v849_v10 }
  0x2a   : > { %680 = vmatpush3.bf16.msra.mxu0 %v756_v16 }
  0x2b   : > { %681 = vmatprep.subr.bf16.mxu0 %v849_v10  ;;  %v767_v21 = vpop.eup %766 }
  0x2c   : > { %v256_v22 = vmul.f32 0.6931472, %v767_v21 }
  0x2e   : > { %682 = vmatpush3.bf16.msra.mxu0 %v757_v17 }
  0x97   : > { %v264_v23 = vpop.permute.xlu0 %263 }
  0x98   : > { %v266_v24 = vmul.f32 %v264_v23, %v256_v22  ;;  %v758_v22 = vld [vmem:[%s1081_s4] sm:$0xff]   ;;  %v760_v23 = vld [vmem:[%s1081_s4 + $0x10] sm:$0xff]  }
  0x99   : > { %688 = vmatpush3.bf16.msra.mxu1 %v758_v22 }
  0x9a   : > { %v267_v25 = vmul.f32 1.442695, %v266_v24  ;;  %689 = vmatprep.subr.bf16.mxu1 %v849_v10  ;;  %v761_v24 = vld [vmem:[%s1081_s4 + $0x18] sm:$0xff]  }
  0x9b   : > { %v283_v33 = vpop.permute.xlu0 %282 }
  0x9c   : > { %768 = vpow2.f32 %v267_v25  ;;  %v288_v35 = vrot.slane %v283_v33, %v938_v7  ;;  %v762_v25 = vld [vmem:[%s1081_s4 + $0x20] sm:$0xff]  }
  0xa6   : > { %v769_v26 = vpop.eup %768 }
  0xa7   : > { %v270_v27 = vsel %vm269_vm1, %v769_v26, 0.0  ;;  %v763_v26 = vld [vmem:[%s1081_s4 + $0x28] sm:$0xff]  }
  0xa8   : > { %v271_v28 = vrot.slane %v270_v27, 4 }
  0xaa   : > { %v272_v29 = vadd.f32 %v271_v28, %v270_v27  ;;  %v764_v27 = vld [vmem:[%s1081_s4 + $0x30] sm:$0xff]   ;;  %v765_v28 = vld [vmem:[%s1081_s4 + $0x38] sm:$0xff]  }
  0xac   : > { %v273_v30 = vrot.slane %v272_v29, 2 }
  0xae   : > { %v274_v31 = vadd.f32 %v273_v30, %v272_v29 }
  0xb0   : > { %v275_v32 = vrot.slane %v274_v31, 1 }
  0xb2   : > { %v276_v34 = vadd.f32 %v275_v32, %v274_v31 }
  0xb4   : > { %v278_v36 = vmul.f32 0.25, %v276_v34 }
  0xb6   : > { %770 = vlog2.f32 %v278_v36 }
  0xb7   : > { %772 = vrcp.f32 %v288_v35 }
  0xc0   : > { %v771_v37 = vpop.eup %770 }
  0xc1   : > { %v280_v38 = vmul.f32 0.6931472, %v771_v37  ;;  %v773_v39 = vpop.eup %772 }
  0xc3   : > { %v290_v40 = vmul.f32 %v773_v39, %v280_v38 }
  0xc5   : > { %v291_v41 = vmul.f32 1.442695, %v290_v40 }
  0xc7   : > { %774 = vpow2.f32 %v291_v41 }
  0xd1   : > { %v775_v42 = vpop.eup %774 }
  0xd2   : > { %v293_v43 = vpack.c.bf16 %v775_v42, %v775_v42 }
  0xd4   : > { %684 = vmatmul.mubr.bf16.vlgmr.msra.gmra.mrb[0].mxu0 %v293_v43 }
 0x1a7   : > { %v393_v45 = vpop.f32.mrb[0].mxu0 }
 0x1a8   : > { %v394_v46 = vadd.f32 %v393_v45, %v310_v44  ;;  %v685_v47 = vpop.f32.mrb[1].mxu0 }
 0x1a9   : > { %v396_v48 = vpop.f32.mrb[2].mxu0 }
 0x1aa   : > { %v402_v49 = vrot.slane %v394_v46, %v938_v7  ;;  %v686_v50 = vpop.f32.mrb[3].mxu0 }
 0x1ac   : > { %v403_v51 = vmul.f32 %v402_v49, %v981_v19 }
 0x1ae   : > { %v404_v52 = vsel %vm269_vm1, %v403_v51, 0.0 }
 0x1af   : > { %405 = vadd.xlane.f32.xlu1 %v404_v52 }
 0x23c   : > { %v406_v53 = vpop.xlane.xlu1 %405 }
 0x23d   : > { %v407_v54 = vmul.f32 0.088388346, %v406_v53 }
 0x23f   : > { %v408_v55 = vsel %vm269_vm1, %v407_v54, -inf }
 0x240   : > { %v409_v56 = vrot.slane %v408_v55, 4 }
 0x242   : > { %v410_v57 = vmax.f32 %v408_v55, %v409_v56 }
 0x244   : > { %v411_v58 = vrot.slane %v410_v57, 2 }
 0x246   : > { %v412_v59 = vmax.f32 %v410_v57, %v411_v58 }
 0x248   : > { %v413_v60 = vrot.slane %v412_v59, 1 }
 0x24a   : > { %v414_v61 = vmax.f32 %v412_v59, %v413_v60 }
 0x24c   : > { %v415_v62 = vsub.f32 %v407_v54, %v414_v61 }
 0x24e   : > { %v416_v63 = vmul.f32 1.442695, %v415_v62 }
 0x250   : > { %776 = vpow2.f32 %v416_v63 }
 0x25a   : > { %v777_v0 = vpop.eup %776 }
 0x25b   : > { %v418_v1 = vsel %vm269_vm1, %v777_v0, 0.0 }
 0x25c   : > { %v419_v2 = vrot.slane %v418_v1, 4 }
 0x25e   : > { %v420_v3 = vadd.f32 %v419_v2, %v418_v1 }
 0x260   : > { %v421_v4 = vrot.slane %v420_v3, 2 }
 0x262   : > { %v422_v5 = vadd.f32 %v421_v4, %v420_v3 }
 0x264   : > { %v423_v6 = vrot.slane %v422_v5, 1 }
 0x266   : > { %v424_v7 = vadd.f32 %v423_v6, %v422_v5 }
 0x268   : > { %778 = vrcp.f32 %v424_v7 }
 0x272   : > { %v779_v8 = vpop.eup %778 }
 0x273   : > { %v426_v9 = vmul.f32 %v779_v8, %v777_v0 }
 0x275   : > { %v427_v11 = vmul.f32 %v426_v9, %v981_v19  ;;  %v759_v19 = vld [vmem:[%s1081_s4 + $0x8] sm:$0xff]  }
 0x276   : > { %690 = vmatpush3.bf16.msra.mxu1 %v759_v19 }
 0x277   : > { %v428_v12 = vsel %vm269_vm1, %v427_v11, 0.0  ;;  %691 = vmatprep.subr.bf16.mxu1 %v849_v10 }
 0x278   : > { %v429_v13 = vrot.slane %v428_v12, 4 }
 0x27a   : > { %v430_v14 = vadd.f32 %v429_v13, %v428_v12  ;;  %692 = vmatpush3.bf16.msra.mxu1 %v760_v23 }
 0x27b   : > { %693 = vmatprep.subr.bf16.mxu1 %v849_v10 }
 0x27c   : > { %v431_v15 = vrot.slane %v430_v14, 2 }
 0x27e   : > { %v432_v16 = vadd.f32 %v431_v15, %v430_v14  ;;  %694 = vmatpush3.bf16.msra.mxu1 %v761_v24 }
 0x27f   : > { %695 = vmatprep.subr.bf16.mxu1 %v849_v10 }
 0x280   : > { %v433_v17 = vrot.slane %v432_v16, 1 }
 0x282   : > { %v434_v18 = vadd.f32 %v433_v17, %v432_v16  ;;  %696 = vmatpush3.bf16.msra.mxu1 %v762_v25 }
 0x283   : > { %697 = vmatprep.subr.bf16.mxu1 %v849_v10 }
 0x284   : > { %v435_v20 = vmul.f32 %v434_v18, %v434_v18 }
 0x286   : > { %v436_v21 = vmul.f32 %v435_v20, %v435_v20  ;;  %698 = vmatpush3.bf16.msra.mxu1 %v763_v26 }
 0x287   : > { %699 = vmatprep.subr.bf16.mxu1 %v849_v10 }
 0x288   : > { %437 = vadd.xlane.f32.xlu1 %v436_v21 }
 0x28a   : > { %700 = vmatpush3.bf16.msra.mxu1 %v764_v27 }
 0x28b   : > { %701 = vmatprep.subr.bf16.mxu1 %v849_v10  ;;  %v466_v10 = vld [vmem:[%s1082_s5] sm:$0x1] }
 0x28e   : > { %702 = vmatpush3.bf16.msra.mxu1 %v765_v28 }
 0x315   : > { %v438_v29 = vpop.xlane.xlu1 %437 }
 0x316   : > { %780 = vrsqrt.f32 %v438_v29  ;;  %vm441_vm2 = vcmp.eq.f32.partialorder %v438_v29, inf  ;;  %v444_v32 = vand.u32 2147483648, %v438_v29  ;;  %vm443_vm3 = vcmp.eq.f32.partialorder %v438_v29, 0.0 }
 0x320   : > { %v781_v30 = vpop.eup %780 }
 0x321   : > { %v440_v31 = vmul.f32 %v781_v30, %v438_v29 }
 0x323   : > { %v442_v33 = vsel %vm441_vm2, %v438_v29, %v440_v31 }
 0x324   : > { %v445_v34 = vsel %vm443_vm3, %v444_v32, %v442_v33 }
 0x325   : > { %v446_v35 = vmax.f32 %v445_v34, 1e-12 }
 0x327   : > { %782 = vrcp.f32 %v446_v35 }
 0x331   : > { %v783_v36 = vpop.eup %782 }
 0x332   : > { %v448_v37 = vmul.f32 %v783_v36, %v435_v20 }
 0x334   : > { %v449_v38 = vpack.c.bf16 %v448_v37, %v448_v37 }
 0x336   : > { %704 = vmatmul.mubr.bf16.vlgmr.msra.gmra.mrb[0].mxu1 %v449_v38 }
 0x409   : > { %v549_v39 = vpop.f32.mrb[0].mxu1 }
 0x40a   : > { %v550_v40 = vadd.f32 %v549_v39, %v466_v10  ;;  %v705_v41 = vpop.f32.mrb[1].mxu1 }
 0x40b   : > { %v552_v42 = vpop.f32.mrb[2].mxu1 }
 0x40c   : > { %v706_v43 = vpop.f32.mrb[3].mxu1  ;;  %556 = vst.msk [vmem:[%s243_s21] sm:$0x1] %vm555_vm4, %v550_v40 }
 0x40d   : > { %797 = shalt.err (!%p794_p3)
}
 0x40e   : > { %s798_s14 = scalar_lea.hbm %s1035_s30, 16  ;;  %s802_s17 = scalar_lea.hbm %s1083_s6, 32 }
 0x40f   : > { %p799_p4 = scmp.ne.s32.totalorder %s1035_s30, %s798_s14  ;;  %p803_p9 = scmp.lt.u32.totalorder %s1035_s30, %s1083_s6 }
 0x410   : > { %p804_p10 = scmp.lt.u32.totalorder %s802_s17, %s798_s14  ;;  %p806_p12 = scmp.lt.u32.totalorder %s798_s14, %s1035_s30 }
 0x411   : > { %p800_p7 = pnand %p799_p4, %p928_p5 }
 0x412   : > { %p805_p11 = por %p804_p10, %p803_p9 }
 0x413   : > { %p801_p8 = pneg %p800_p7 }
 0x414   : > { %p807_p13 = por %p806_p12, %p805_p11 }
 0x416   : > { %p808_p0 = pnand %p807_p13, %p801_p8 }
 0x418   : > { %811 = shalt.err (!%p808_p0)
}
 0x419   : > { %707 = dma.vmem_to_hbm [thread:$0]  (%p928_p5), %s1037_s22, 16, %s1035_s30, %s558_s0  }
 0x41a PF: > { %p713_p1 = scmp.ge.s32.totalorder %s846_s26, 2  ;;  %s582_s20 = sand.u32 1, %s834_s23  }
 0x41b   : > { %s583_s21 = scalar_lea.sflag [#allocation4], %s582_s20 }
 0x41c   : > { %p710_p2 = pnand %p713_p1, %p932_p6 }
 0x41e   : > { %829 = dma.done.wait (!%p710_p2), %s583_s21, 16  }
 0x41f   : > { %831 = vsyncadd (!%p710_p2), %s583_s21, 4294967280  ;;  %p18_p3 = scmp.ge.s32.totalorder %s915_s28, 4   ;;  %s1086_s23 = smov %s838_s24 }
 0x420   : > { %s1087_s24 = smov %s842_s25  ;;  %s1088_s25 = smov %s926_s7 }
 0x421   : > { %s1089_s26 = smov %s915_s28  ;;  %20 = sbr.rel (!%p18_p3) target bundleno = 6 (0x6), region = 79 }
 0x428   :  { %587 = vsyncpa [#allocation4], 1 }
 0x429   :  { %589 = vsyncpa [#allocation4 + $0x1], 1 }

</bundles_post_ra>
